<compile_context>
chip_gen: v7x
topology: tpu7x:2x2x1
jax: 0.10.0
libtpu: 0.0.40
codegen_flags: <defaults>
</compile_context>

<pallas_src>
import functools
import math

import jax
import jax.numpy as jnp
from jax.experimental import pallas as pl
from jax.experimental.pallas import tpu as pltpu

# Module constants (fixed by the PyTorch source).
D_Q = 64
D_V = 64
D_MODEL = 256
N_HEAD = 1
D_FF = 256
N_LAYERS = 6
D_FEATURE = 3
N_MASKS = 6          # EncoderLayer uses 6 attention branches, masks blockM[:, 0..5]
LN_EPS = 1e-5        # torch.nn.LayerNorm default (fresh LN each fwd -> gamma=1, beta=0)


def _layernorm(y):
    # LayerNorm over the last dim with gamma=1, beta=0 (fresh nn.LayerNorm).
    mu = jnp.mean(y, axis=-1, keepdims=True)
    var = jnp.mean(jnp.square(y - mu), axis=-1, keepdims=True)
    return (y - mu) * jax.lax.rsqrt(var + LN_EPS)


# ---------------------------------------------------------------------------
# Single fused kernel: pos2emb + final EncoderLayer, one batch *block* per
# grid step.  All weights are resident in VMEM (constant index_maps).
# ---------------------------------------------------------------------------
def fused_encoder_kernel(pos_ref, mask_ref, posw_ref, posb_ref,
                         wqkv_ref, wo_ref, wff1_ref, wff2_ref, o_ref):
    Bb, S, _ = pos_ref.shape                       # batch block, seq (static)
    H = N_MASKS

    # --- position2embedding: Linear(3 -> 256) with bias ----------------------
    # K=3 contraction as 3 broadcast-FMAs on the VPU (no lane-dim-3 MXU
    # operand), f32 throughout.  Batch folded into the row (M) dimension.
    p = pos_ref[...].reshape(Bb * S, D_FEATURE)
    x = (p[:, 0:1] * posw_ref[0:1, :]
         + p[:, 1:2] * posw_ref[1:2, :]
         + p[:, 2:3] * posw_ref[2:3, :]
         + posb_ref[...])                          # (Bb*S, 256) f32

    # --- fused QKV projection: one (Bb*S, 256) @ (256, 1152) matmul ----------
    qkv = jnp.dot(x.astype(jnp.bfloat16), wqkv_ref[...],
                  preferred_element_type=jnp.float32)       # (Bb*S, 1152) f32

    def split_heads(base):
        # Stack the six 64-wide lane slices head-major -> (H, Bb*S, 64).
        return jnp.stack(
            [qkv[:, base + h * D_Q: base + (h + 1) * D_Q] for h in range(H)],
            axis=0)

    q_h = split_heads(0)                    # Q columns (scale pre-folded)
    k_h = split_heads(H * D_Q)
    v_h = split_heads(2 * H * D_Q)

    # (H, Bb*S, D) and (H*Bb, S, D) share the same row-major layout -> free view.
    q_bh = q_h.reshape(H * Bb, S, D_Q)
    k_bh = k_h.reshape(H * Bb, S, D_Q)
    v_bh = v_h.reshape(H * Bb, S, D_V)

    # Mask (head-major to match): (Bb, H, S, S) int8 -> (H*Bb, S, S) bool.
    m = mask_ref[...].astype(jnp.float32).transpose(1, 0, 2, 3)
    masked = m.reshape(H * Bb, S, S) == 0.0        # graph_attn_mask: blockM == 0

    # --- scores: (h, b)-batched matmul; 1/sqrt(d_Q) already folded into W_Q --
    s = jnp.einsum('nqd,nkd->nqk', q_bh, k_bh,
                   preferred_element_type=jnp.float32)      # (H*Bb, S, S)
    s = jnp.where(masked, -1.0e9, s)               # masked_fill_(mask, -1e9)

    # --- ONE softmax over the whole (H*Bb, S, S) slab (f32 stats) ------------
    smax = jnp.max(s, axis=-1, keepdims=True)
    ex = jnp.exp(s - smax)
    denom = jnp.sum(ex, axis=-1, keepdims=True)
    attn = ex * pl.reciprocal(denom, approx=True)  # EUP reciprocal
    attn = jnp.where(masked, 0.0, attn)            # masked_fill_(mask, 0)

    ctx = jnp.einsum('nqk,nkd->nqd', attn, v_bh,
                     preferred_element_type=jnp.float32)    # (H*Bb, S, 64)

    # --- per-head output projection as one head-batched matmul ---------------
    ctx_h = ctx.reshape(H, Bb * S, D_V).astype(jnp.bfloat16)
    out = jnp.einsum('hnd,hdm->hnm', ctx_h, wo_ref[...],
                     preferred_element_type=jnp.float32)    # (H, Bb*S, 256)

    # --- ONE residual + LayerNorm across all 6 branches, then sum over heads -
    acc = jnp.sum(_layernorm(out + x[None, :, :]), axis=0)  # (Bb*S, 256) f32

    # --- position-wise FFN: Linear -> ReLU -> Linear, residual + LayerNorm ---
    h1 = jnp.maximum(
        jnp.dot(acc.astype(jnp.bfloat16), wff1_ref[...],
                preferred_element_type=jnp.float32), 0.0)
    ffo = jnp.dot(h1.astype(jnp.bfloat16), wff2_ref[...],
                  preferred_element_type=jnp.float32)
    o = _layernorm(ffo + acc)
    o_ref[...] = o.reshape(Bb, S, D_MODEL).astype(o_ref.dtype)

    # TODO(synk): for S >~ 1k, tile attention over the key axis (online softmax)
    # and stage q/k/v through VMEM scratch to respect v7x's 64 MiB VMEM budget.


# ---------------------------------------------------------------------------
# Parameter construction (deterministic, synthetic) and Encoder forward.
# ---------------------------------------------------------------------------
def init_params(key):
    keys = jax.random.split(key, 2 + N_LAYERS)
    params = {
        "pos_w": jax.random.normal(keys[0], (D_FEATURE, D_MODEL), jnp.float32)
        / math.sqrt(D_FEATURE),
        "pos_b": jax.random.normal(keys[1], (1, D_MODEL), jnp.float32) * 0.01,
        "layers": [],
    }
    inv_sqrt_dq = 1.0 / math.sqrt(D_Q)
    for l in range(N_LAYERS):
        k = jax.random.split(keys[2 + l], 6)
        sm = 1.0 / math.sqrt(D_MODEL)
        sv = 1.0 / math.sqrt(D_V)
        wq = jax.random.normal(k[0], (D_MODEL, N_MASKS * D_Q), jnp.float32) * sm
        wk = jax.random.normal(k[1], (D_MODEL, N_MASKS * D_Q), jnp.float32) * sm
        wv = jax.random.normal(k[2], (D_MODEL, N_MASKS * D_V), jnp.float32) * sm
        # Fused QKV weight (256, 1152), bf16 for the MXU.  The 1/sqrt(d_Q)
        # attention scale is folded into the Q columns here (when importing
        # torch weights, multiply W_Q by 1/sqrt(d_Q) at this point).
        wqkv = jnp.concatenate([wq * inv_sqrt_dq, wk, wv], axis=1).astype(jnp.bfloat16)
        params["layers"].append({
            "wqkv": wqkv,
            "wo": (jax.random.normal(k[3], (N_MASKS, D_V, D_MODEL), jnp.float32) * sv
                   ).astype(jnp.bfloat16),
            "wff1": (jax.random.normal(k[4], (D_MODEL, D_FF), jnp.float32) * sm
                     ).astype(jnp.bfloat16),
            "wff2": (jax.random.normal(k[5], (D_FF, D_MODEL), jnp.float32) * sm
                     ).astype(jnp.bfloat16),
        })
    return params


def _grid_blocks(batch):
    # v7x has 2 TensorCores per chip -> keep 2 "parallel" grid steps so both
    # stay busy; v5e/v6e have 1 TC -> collapse to a single step with the whole
    # batch folded into the matmul M dimension (no serial grid overhead).
    try:
        kind = jax.devices()[0].device_kind.lower()
    except Exception:
        kind = ""
    blocks = 2 if ("v7" in kind and batch >= 2) else 1
    if batch % blocks != 0:
        blocks = 1
    return blocks


@jax.jit
def encoder_forward(position, blockM, params):
    B, S, _ = position.shape
    nblk = _grid_blocks(B)
    b_blk = B // nblk

    # The kernel only tests blockM == 0: ship it as int8 (4x smaller DMA).
    blockM = blockM.astype(jnp.int8)

    # The PyTorch loop feeds enc_pos_embeddings (not the previous output) into
    # every layer and returns only the last result -> run only the final layer.
    lp = params["layers"][-1]

    return pl.pallas_call(
        fused_encoder_kernel,
        out_shape=jax.ShapeDtypeStruct((B, S, D_MODEL), jnp.float32),
        grid_spec=pltpu.PrefetchScalarGridSpec(
            num_scalar_prefetch=0,
            grid=(nblk,),
            in_specs=[
                pl.BlockSpec((b_blk, S, D_FEATURE), lambda i: (i, 0, 0)),        # position
                pl.BlockSpec((b_blk, N_MASKS, S, S), lambda i: (i, 0, 0, 0)),    # blockM int8
                pl.BlockSpec((D_FEATURE, D_MODEL), lambda i: (0, 0)),            # pos_w
                pl.BlockSpec((1, D_MODEL), lambda i: (0, 0)),                    # pos_b
                pl.BlockSpec((D_MODEL, 3 * N_MASKS * D_Q), lambda i: (0, 0)),    # fused W_qkv
                pl.BlockSpec((N_MASKS, D_V, D_MODEL), lambda i: (0, 0, 0)),      # W_O (per head)
                pl.BlockSpec((D_MODEL, D_FF), lambda i: (0, 0)),                 # W_ff1
                pl.BlockSpec((D_FF, D_MODEL), lambda i: (0, 0)),                 # W_ff2
            ],
            out_specs=pl.BlockSpec((b_blk, S, D_MODEL), lambda i: (i, 0, 0)),
        ),
        compiler_params=pltpu.CompilerParams(
            dimension_semantics=("parallel",),
            vmem_limit_bytes=32 * 1024 * 1024),
    )(position, blockM, params["pos_w"], params["pos_b"],
      lp["wqkv"], lp["wo"], lp["wff1"], lp["wff2"])


if __name__ == "__main__":
    key = jax.random.PRNGKey(0)
    k_pos, k_mask, k_param = jax.random.split(key, 3)

    batch, seq = 2, 8
    position = jax.random.normal(k_pos, (batch, seq, D_FEATURE), jnp.float32)
    blockM = jax.random.bernoulli(
        k_mask, 0.6, (batch, N_MASKS, seq, seq)).astype(jnp.int8)

    params = init_params(k_param)

    out = encoder_forward(position, blockM, params)
    jax.block_until_ready(out)
    assert out.shape == (batch, seq, D_MODEL)
    assert bool(jnp.all(jnp.isfinite(out)))
    print("KERNEL_OK")
</pallas_src>

<mosaic_0001>
module attributes {stable_mosaic.version = 11 : i64} {
  func.func @fused_encoder_kernel(%arg0: i32, %arg1: memref<2x8x3xf32, #tpu.memory_space<vmem>>, %arg2: memref<2x6x8x8xi8, #tpu.memory_space<vmem>>, %arg3: memref<3x256xf32, #tpu.memory_space<vmem>>, %arg4: memref<1x256xf32, #tpu.memory_space<vmem>>, %arg5: memref<256x1152xbf16, #tpu.memory_space<vmem>>, %arg6: memref<6x64x256xbf16, #tpu.memory_space<vmem>>, %arg7: memref<256x256xbf16, #tpu.memory_space<vmem>>, %arg8: memref<256x256xbf16, #tpu.memory_space<vmem>>, %arg9: memref<2x8x256xf32, #tpu.memory_space<vmem>>) attributes {dimension_semantics = [#tpu.dimension_semantics<parallel>], iteration_bounds = array<i64: 1>, scalar_prefetch = 0 : i64, scratch_operands = 0 : i64, tpu.core_type = #tpu.core_type<tc>, window_params = [{transform_indices = @transform_0, window_bounds = array<i64: 2, 8, 3>}, {transform_indices = @transform_1, window_bounds = array<i64: 2, 6, 8, 8>}, {pipeline_mode = #tpu.pipeline_mode<synchronous>, transform_indices = @transform_2, window_bounds = array<i64: 3, 256>}, {pipeline_mode = #tpu.pipeline_mode<synchronous>, transform_indices = @transform_3, window_bounds = array<i64: 1, 256>}, {pipeline_mode = #tpu.pipeline_mode<synchronous>, transform_indices = @transform_4, window_bounds = array<i64: 256, 1152>}, {pipeline_mode = #tpu.pipeline_mode<synchronous>, transform_indices = @transform_5, window_bounds = array<i64: 6, 64, 256>}, {pipeline_mode = #tpu.pipeline_mode<synchronous>, transform_indices = @transform_6, window_bounds = array<i64: 256, 256>}, {pipeline_mode = #tpu.pipeline_mode<synchronous>, transform_indices = @transform_7, window_bounds = array<i64: 256, 256>}, {transform_indices = @transform_8, window_bounds = array<i64: 2, 8, 256>}]} {
    %c0 = arith.constant 0 : index
    %c0_0 = arith.constant 0 : index
    %c0_1 = arith.constant 0 : index
    %0 = vector.load %arg1[%c0, %c0_0, %c0_1] : memref<2x8x3xf32, #tpu.memory_space<vmem>>, vector<2x8x3xf32>
    %1 = vector.shape_cast %0 : vector<2x8x3xf32> to vector<16x3xf32>
    %2 = vector.extract_strided_slice %1 {offsets = [0, 0], sizes = [16, 1], strides = [1, 1]} : vector<16x3xf32> to vector<16x1xf32>
    %c0_2 = arith.constant 0 : index
    %c0_3 = arith.constant 0 : index
    %3 = vector.load %arg3[%c0_2, %c0_3] : memref<3x256xf32, #tpu.memory_space<vmem>>, vector<1x256xf32>
    %4 = vector.broadcast %2 : vector<16x1xf32> to vector<16x256xf32>
    %5 = vector.broadcast %3 : vector<1x256xf32> to vector<16x256xf32>
    %6 = arith.mulf %4, %5 : vector<16x256xf32>
    %7 = vector.extract_strided_slice %1 {offsets = [0, 1], sizes = [16, 1], strides = [1, 1]} : vector<16x3xf32> to vector<16x1xf32>
    %c1 = arith.constant 1 : index
    %c0_4 = arith.constant 0 : index
    %8 = vector.load %arg3[%c1, %c0_4] : memref<3x256xf32, #tpu.memory_space<vmem>>, vector<1x256xf32>
    %9 = vector.broadcast %7 : vector<16x1xf32> to vector<16x256xf32>
    %10 = vector.broadcast %8 : vector<1x256xf32> to vector<16x256xf32>
    %11 = arith.mulf %9, %10 : vector<16x256xf32>
    %12 = arith.addf %6, %11 : vector<16x256xf32>
    %13 = vector.extract_strided_slice %1 {offsets = [0, 2], sizes = [16, 1], strides = [1, 1]} : vector<16x3xf32> to vector<16x1xf32>
    %c2 = arith.constant 2 : index
    %c0_5 = arith.constant 0 : index
    %14 = vector.load %arg3[%c2, %c0_5] : memref<3x256xf32, #tpu.memory_space<vmem>>, vector<1x256xf32>
    %15 = vector.broadcast %13 : vector<16x1xf32> to vector<16x256xf32>
    %16 = vector.broadcast %14 : vector<1x256xf32> to vector<16x256xf32>
    %17 = arith.mulf %15, %16 : vector<16x256xf32>
    %18 = arith.addf %12, %17 : vector<16x256xf32>
    %c0_6 = arith.constant 0 : index
    %c0_7 = arith.constant 0 : index
    %19 = vector.load %arg4[%c0_6, %c0_7] : memref<1x256xf32, #tpu.memory_space<vmem>>, vector<1x256xf32>
    %20 = vector.broadcast %19 : vector<1x256xf32> to vector<16x256xf32>
    %21 = arith.addf %18, %20 : vector<16x256xf32>
    %22 = arith.truncf %21 : vector<16x256xf32> to vector<16x256xbf16>
    %c0_8 = arith.constant 0 : index
    %c0_9 = arith.constant 0 : index
    %23 = vector.load %arg5[%c0_8, %c0_9] : memref<256x1152xbf16, #tpu.memory_space<vmem>>, vector<256x1152xbf16>
    %cst = arith.constant dense<0.000000e+00> : vector<16x1152xf32>
    %24 = tpu.matmul %22, %23, %cst {dimension_numbers = #tpu.dot_dimension_numbers<[1], [0], [0], [1], [0, 0, 1, 1], [], []>} : vector<16x256xbf16>, vector<256x1152xbf16>, vector<16x1152xf32> -> vector<16x1152xf32>
    %25 = vector.extract_strided_slice %24 {offsets = [0, 0], sizes = [16, 64], strides = [1, 1]} : vector<16x1152xf32> to vector<16x64xf32>
    %26 = vector.extract_strided_slice %24 {offsets = [0, 64], sizes = [16, 64], strides = [1, 1]} : vector<16x1152xf32> to vector<16x64xf32>
    %27 = vector.extract_strided_slice %24 {offsets = [0, 128], sizes = [16, 64], strides = [1, 1]} : vector<16x1152xf32> to vector<16x64xf32>
    %28 = vector.extract_strided_slice %24 {offsets = [0, 192], sizes = [16, 64], strides = [1, 1]} : vector<16x1152xf32> to vector<16x64xf32>
    %29 = vector.extract_strided_slice %24 {offsets = [0, 256], sizes = [16, 64], strides = [1, 1]} : vector<16x1152xf32> to vector<16x64xf32>
    %30 = vector.extract_strided_slice %24 {offsets = [0, 320], sizes = [16, 64], strides = [1, 1]} : vector<16x1152xf32> to vector<16x64xf32>
    %31 = vector.shape_cast %25 : vector<16x64xf32> to vector<1x16x64xf32>
    %32 = vector.shape_cast %26 : vector<16x64xf32> to vector<1x16x64xf32>
    %33 = vector.shape_cast %27 : vector<16x64xf32> to vector<1x16x64xf32>
    %34 = vector.shape_cast %28 : vector<16x64xf32> to vector<1x16x64xf32>
    %35 = vector.shape_cast %29 : vector<16x64xf32> to vector<1x16x64xf32>
    %36 = vector.shape_cast %30 : vector<16x64xf32> to vector<1x16x64xf32>
    %37 = tpu.concatenate %31, %32, %33, %34, %35, %36 in 0 : vector<1x16x64xf32>, vector<1x16x64xf32>, vector<1x16x64xf32>, vector<1x16x64xf32>, vector<1x16x64xf32>, vector<1x16x64xf32> -> vector<6x16x64xf32>
    %38 = vector.extract_strided_slice %24 {offsets = [0, 384], sizes = [16, 64], strides = [1, 1]} : vector<16x1152xf32> to vector<16x64xf32>
    %39 = vector.extract_strided_slice %24 {offsets = [0, 448], sizes = [16, 64], strides = [1, 1]} : vector<16x1152xf32> to vector<16x64xf32>
    %40 = vector.extract_strided_slice %24 {offsets = [0, 512], sizes = [16, 64], strides = [1, 1]} : vector<16x1152xf32> to vector<16x64xf32>
    %41 = vector.extract_strided_slice %24 {offsets = [0, 576], sizes = [16, 64], strides = [1, 1]} : vector<16x1152xf32> to vector<16x64xf32>
    %42 = vector.extract_strided_slice %24 {offsets = [0, 640], sizes = [16, 64], strides = [1, 1]} : vector<16x1152xf32> to vector<16x64xf32>
    %43 = vector.extract_strided_slice %24 {offsets = [0, 704], sizes = [16, 64], strides = [1, 1]} : vector<16x1152xf32> to vector<16x64xf32>
    %44 = vector.shape_cast %38 : vector<16x64xf32> to vector<1x16x64xf32>
    %45 = vector.shape_cast %39 : vector<16x64xf32> to vector<1x16x64xf32>
    %46 = vector.shape_cast %40 : vector<16x64xf32> to vector<1x16x64xf32>
    %47 = vector.shape_cast %41 : vector<16x64xf32> to vector<1x16x64xf32>
    %48 = vector.shape_cast %42 : vector<16x64xf32> to vector<1x16x64xf32>
    %49 = vector.shape_cast %43 : vector<16x64xf32> to vector<1x16x64xf32>
    %50 = tpu.concatenate %44, %45, %46, %47, %48, %49 in 0 : vector<1x16x64xf32>, vector<1x16x64xf32>, vector<1x16x64xf32>, vector<1x16x64xf32>, vector<1x16x64xf32>, vector<1x16x64xf32> -> vector<6x16x64xf32>
    %51 = vector.extract_strided_slice %24 {offsets = [0, 768], sizes = [16, 64], strides = [1, 1]} : vector<16x1152xf32> to vector<16x64xf32>
    %52 = vector.extract_strided_slice %24 {offsets = [0, 832], sizes = [16, 64], strides = [1, 1]} : vector<16x1152xf32> to vector<16x64xf32>
    %53 = vector.extract_strided_slice %24 {offsets = [0, 896], sizes = [16, 64], strides = [1, 1]} : vector<16x1152xf32> to vector<16x64xf32>
    %54 = vector.extract_strided_slice %24 {offsets = [0, 960], sizes = [16, 64], strides = [1, 1]} : vector<16x1152xf32> to vector<16x64xf32>
    %55 = vector.extract_strided_slice %24 {offsets = [0, 1024], sizes = [16, 64], strides = [1, 1]} : vector<16x1152xf32> to vector<16x64xf32>
    %56 = vector.extract_strided_slice %24 {offsets = [0, 1088], sizes = [16, 64], strides = [1, 1]} : vector<16x1152xf32> to vector<16x64xf32>
    %57 = vector.shape_cast %51 : vector<16x64xf32> to vector<1x16x64xf32>
    %58 = vector.shape_cast %52 : vector<16x64xf32> to vector<1x16x64xf32>
    %59 = vector.shape_cast %53 : vector<16x64xf32> to vector<1x16x64xf32>
    %60 = vector.shape_cast %54 : vector<16x64xf32> to vector<1x16x64xf32>
    %61 = vector.shape_cast %55 : vector<16x64xf32> to vector<1x16x64xf32>
    %62 = vector.shape_cast %56 : vector<16x64xf32> to vector<1x16x64xf32>
    %63 = tpu.concatenate %57, %58, %59, %60, %61, %62 in 0 : vector<1x16x64xf32>, vector<1x16x64xf32>, vector<1x16x64xf32>, vector<1x16x64xf32>, vector<1x16x64xf32>, vector<1x16x64xf32> -> vector<6x16x64xf32>
    %64 = vector.shape_cast %37 : vector<6x16x64xf32> to vector<12x8x64xf32>
    %65 = vector.shape_cast %50 : vector<6x16x64xf32> to vector<12x8x64xf32>
    %66 = vector.shape_cast %63 : vector<6x16x64xf32> to vector<12x8x64xf32>
    %c0_10 = arith.constant 0 : index
    %c0_11 = arith.constant 0 : index
    %c0_12 = arith.constant 0 : index
    %c0_13 = arith.constant 0 : index
    %67 = vector.load %arg2[%c0_10, %c0_11, %c0_12, %c0_13] : memref<2x6x8x8xi8, #tpu.memory_space<vmem>>, vector<2x6x8x8xi8>
    %68 = arith.sitofp %67 : vector<2x6x8x8xi8> to vector<2x6x8x8xf32>
    %69 = tpu.transpose %68, [1, 0, 2, 3] : vector<2x6x8x8xf32> -> vector<6x2x8x8xf32>
    %70 = vector.shape_cast %69 : vector<6x2x8x8xf32> to vector<12x8x8xf32>
    %cst_14 = arith.constant 0.000000e+00 : f32
    %71 = vector.broadcast %cst_14 : f32 to vector<12x8x8xf32>
    %72 = arith.cmpf oeq, %70, %71 : vector<12x8x8xf32>
    "tpu.trace_start"() <{level = 10 : i32, message = "nqd,nkd->nqk"}> : () -> ()
    %cst_15 = arith.constant dense<0.000000e+00> : vector<12x8x8xf32>
    %73 = tpu.matmul %64, %65, %cst_15 {dimension_numbers = #tpu.dot_dimension_numbers<[2], [2], [1], [1], [0, 0, 0, 1, 1, 1], [0], [0]>} : vector<12x8x64xf32>, vector<12x8x64xf32>, vector<12x8x8xf32> -> vector<12x8x8xf32>
    %cst_16 = arith.constant -1.000000e+09 : f32
    "tpu.trace_stop"() : () -> ()
    %74 = vector.broadcast %cst_16 : f32 to vector<12x8x8xf32>
    %75 = arith.select %72, %74, %73 : vector<12x8x8xi1>, vector<12x8x8xf32>
    %cst_17 = arith.constant dense<0xFF800000> : vector<12x8xf32>
    %76 = vector.multi_reduction <maximumf>, %75, %cst_17 [2] : vector<12x8x8xf32> to vector<12x8xf32>
    %77 = vector.shape_cast %76 : vector<12x8xf32> to vector<12x8x1xf32>
    %78 = vector.broadcast %77 : vector<12x8x1xf32> to vector<12x8x8xf32>
    %79 = arith.subf %75, %78 : vector<12x8x8xf32>
    %80 = math.exp %79 : vector<12x8x8xf32>
    %cst_18 = arith.constant dense<0.000000e+00> : vector<12x8xf32>
    %81 = vector.multi_reduction <add>, %80, %cst_18 [2] : vector<12x8x8xf32> to vector<12x8xf32>
    %82 = vector.shape_cast %81 : vector<12x8xf32> to vector<12x8x1xf32>
    %83 = tpu.reciprocal %82 {approx = true} : vector<12x8x1xf32> -> vector<12x8x1xf32>
    %84 = vector.broadcast %83 : vector<12x8x1xf32> to vector<12x8x8xf32>
    %85 = arith.mulf %80, %84 : vector<12x8x8xf32>
    %cst_19 = arith.constant 0.000000e+00 : f32
    %86 = vector.broadcast %cst_19 : f32 to vector<12x8x8xf32>
    %87 = arith.select %72, %86, %85 : vector<12x8x8xi1>, vector<12x8x8xf32>
    "tpu.trace_start"() <{level = 10 : i32, message = "nqk,nkd->nqd"}> : () -> ()
    %cst_20 = arith.constant dense<0.000000e+00> : vector<12x8x64xf32>
    %88 = tpu.matmul %87, %66, %cst_20 {dimension_numbers = #tpu.dot_dimension_numbers<[2], [1], [1], [2], [0, 0, 0, 1, 1, 2], [0], [0]>} : vector<12x8x8xf32>, vector<12x8x64xf32>, vector<12x8x64xf32> -> vector<12x8x64xf32>
    "tpu.trace_stop"() : () -> ()
    %89 = vector.shape_cast %88 : vector<12x8x64xf32> to vector<6x16x64xf32>
    %90 = arith.truncf %89 : vector<6x16x64xf32> to vector<6x16x64xbf16>
    %c0_21 = arith.constant 0 : index
    %c0_22 = arith.constant 0 : index
    %c0_23 = arith.constant 0 : index
    %91 = vector.load %arg6[%c0_21, %c0_22, %c0_23] : memref<6x64x256xbf16, #tpu.memory_space<vmem>>, vector<6x64x256xbf16>
    "tpu.trace_start"() <{level = 10 : i32, message = "hnd,hdm->hnm"}> : () -> ()
    %cst_24 = arith.constant dense<0.000000e+00> : vector<6x16x256xf32>
    %92 = tpu.matmul %90, %91, %cst_24 {dimension_numbers = #tpu.dot_dimension_numbers<[2], [1], [1], [2], [0, 0, 0, 1, 1, 2], [0], [0]>} : vector<6x16x64xbf16>, vector<6x64x256xbf16>, vector<6x16x256xf32> -> vector<6x16x256xf32>
    "tpu.trace_stop"() : () -> ()
    %93 = vector.shape_cast %21 : vector<16x256xf32> to vector<1x16x256xf32>
    %94 = vector.broadcast %93 : vector<1x16x256xf32> to vector<6x16x256xf32>
    %95 = arith.addf %92, %94 : vector<6x16x256xf32>
    %cst_25 = arith.constant dense<0.000000e+00> : vector<6x16xf32>
    %96 = vector.multi_reduction <add>, %95, %cst_25 [2] : vector<6x16x256xf32> to vector<6x16xf32>
    %97 = vector.shape_cast %96 : vector<6x16xf32> to vector<6x16x1xf32>
    %cst_26 = arith.constant 2.560000e+02 : f32
    %98 = vector.broadcast %cst_26 : f32 to vector<6x16x1xf32>
    %99 = arith.divf %97, %98 : vector<6x16x1xf32>
    %100 = vector.broadcast %99 : vector<6x16x1xf32> to vector<6x16x256xf32>
    %101 = arith.subf %95, %100 : vector<6x16x256xf32>
    %102 = arith.mulf %101, %101 : vector<6x16x256xf32>
    %cst_27 = arith.constant dense<0.000000e+00> : vector<6x16xf32>
    %103 = vector.multi_reduction <add>, %102, %cst_27 [2] : vector<6x16x256xf32> to vector<6x16xf32>
    %104 = vector.shape_cast %103 : vector<6x16xf32> to vector<6x16x1xf32>
    %cst_28 = arith.constant 2.560000e+02 : f32
    %105 = vector.broadcast %cst_28 : f32 to vector<6x16x1xf32>
    %106 = arith.divf %104, %105 : vector<6x16x1xf32>
    %107 = vector.broadcast %99 : vector<6x16x1xf32> to vector<6x16x256xf32>
    %108 = arith.subf %95, %107 : vector<6x16x256xf32>
    %cst_29 = arith.constant 9.99999974E-6 : f32
    %109 = vector.broadcast %cst_29 : f32 to vector<6x16x1xf32>
    %110 = arith.addf %106, %109 : vector<6x16x1xf32>
    %111 = math.rsqrt %110 : vector<6x16x1xf32>
    %112 = vector.broadcast %111 : vector<6x16x1xf32> to vector<6x16x256xf32>
    %113 = arith.mulf %108, %112 : vector<6x16x256xf32>
    %cst_30 = arith.constant dense<0.000000e+00> : vector<16x256xf32>
    %114 = vector.multi_reduction <add>, %113, %cst_30 [0] : vector<6x16x256xf32> to vector<16x256xf32>
    %115 = arith.truncf %114 : vector<16x256xf32> to vector<16x256xbf16>
    %c0_31 = arith.constant 0 : index
    %c0_32 = arith.constant 0 : index
    %116 = vector.load %arg7[%c0_31, %c0_32] : memref<256x256xbf16, #tpu.memory_space<vmem>>, vector<256x256xbf16>
    %cst_33 = arith.constant dense<0.000000e+00> : vector<16x256xf32>
    %117 = tpu.matmul %115, %116, %cst_33 {dimension_numbers = #tpu.dot_dimension_numbers<[1], [0], [0], [1], [0, 0, 1, 1], [], []>} : vector<16x256xbf16>, vector<256x256xbf16>, vector<16x256xf32> -> vector<16x256xf32>
    %cst_34 = arith.constant 0.000000e+00 : f32
    %118 = vector.broadcast %cst_34 : f32 to vector<16x256xf32>
    %119 = arith.maximumf %117, %118 : vector<16x256xf32>
    %120 = arith.truncf %119 : vector<16x256xf32> to vector<16x256xbf16>
    %c0_35 = arith.constant 0 : index
    %c0_36 = arith.constant 0 : index
    %121 = vector.load %arg8[%c0_35, %c0_36] : memref<256x256xbf16, #tpu.memory_space<vmem>>, vector<256x256xbf16>
    %cst_37 = arith.constant dense<0.000000e+00> : vector<16x256xf32>
    %122 = tpu.matmul %120, %121, %cst_37 {dimension_numbers = #tpu.dot_dimension_numbers<[1], [0], [0], [1], [0, 0, 1, 1], [], []>} : vector<16x256xbf16>, vector<256x256xbf16>, vector<16x256xf32> -> vector<16x256xf32>
    %123 = arith.addf %122, %114 : vector<16x256xf32>
    %cst_38 = arith.constant dense<0.000000e+00> : vector<16xf32>
    %124 = vector.multi_reduction <add>, %123, %cst_38 [1] : vector<16x256xf32> to vector<16xf32>
    %125 = vector.shape_cast %124 : vector<16xf32> to vector<16x1xf32>
    %cst_39 = arith.constant 2.560000e+02 : f32
    %126 = vector.broadcast %cst_39 : f32 to vector<16x1xf32>
    %127 = arith.divf %125, %126 : vector<16x1xf32>
    %128 = vector.broadcast %127 : vector<16x1xf32> to vector<16x256xf32>
    %129 = arith.subf %123, %128 : vector<16x256xf32>
    %130 = arith.mulf %129, %129 : vector<16x256xf32>
    %cst_40 = arith.constant dense<0.000000e+00> : vector<16xf32>
    %131 = vector.multi_reduction <add>, %130, %cst_40 [1] : vector<16x256xf32> to vector<16xf32>
    %132 = vector.shape_cast %131 : vector<16xf32> to vector<16x1xf32>
    %cst_41 = arith.constant 2.560000e+02 : f32
    %133 = vector.broadcast %cst_41 : f32 to vector<16x1xf32>
    %134 = arith.divf %132, %133 : vector<16x1xf32>
    %135 = vector.broadcast %127 : vector<16x1xf32> to vector<16x256xf32>
    %136 = arith.subf %123, %135 : vector<16x256xf32>
    %cst_42 = arith.constant 9.99999974E-6 : f32
    %137 = vector.broadcast %cst_42 : f32 to vector<16x1xf32>
    %138 = arith.addf %134, %137 : vector<16x1xf32>
    %139 = math.rsqrt %138 : vector<16x1xf32>
    %140 = vector.broadcast %139 : vector<16x1xf32> to vector<16x256xf32>
    %141 = arith.mulf %136, %140 : vector<16x256xf32>
    %142 = vector.shape_cast %141 : vector<16x256xf32> to vector<2x8x256xf32>
    %c0_43 = arith.constant 0 : index
    %c0_44 = arith.constant 0 : index
    %c0_45 = arith.constant 0 : index
    %143 = vector.load %arg9[%c0_43, %c0_44, %c0_45] : memref<2x8x256xf32, #tpu.memory_space<vmem>>, vector<2x8x256xf32>
    tpu.vector_store %arg9[%c0_43, %c0_44, %c0_45], %142 {strides = array<i32>} : memref<2x8x256xf32, #tpu.memory_space<vmem>>, vector<2x8x256xf32>,
    return
  }
  func.func @transform_0(%arg0: i32) -> (i32, i32, i32) {
    %c0_i32 = arith.constant 0 : i32
    %c0_i32_0 = arith.constant 0 : i32
    %c0_i32_1 = arith.constant 0 : i32
    return %arg0, %c0_i32, %c0_i32_0 : i32, i32, i32
  }
  func.func @transform_1(%arg0: i32) -> (i32, i32, i32, i32) {
    %c0_i32 = arith.constant 0 : i32
    %c0_i32_0 = arith.constant 0 : i32
    %c0_i32_1 = arith.constant 0 : i32
    %c0_i32_2 = arith.constant 0 : i32
    return %arg0, %c0_i32, %c0_i32_0, %c0_i32_1 : i32, i32, i32, i32
  }
  func.func @transform_2(%arg0: i32) -> (i32, i32) {
    %c0_i32 = arith.constant 0 : i32
    %c0_i32_0 = arith.constant 0 : i32
    %c0_i32_1 = arith.constant 0 : i32
    return %c0_i32, %c0_i32_0 : i32, i32
  }
  func.func @transform_3(%arg0: i32) -> (i32, i32) {
    %c0_i32 = arith.constant 0 : i32
    %c0_i32_0 = arith.constant 0 : i32
    %c0_i32_1 = arith.constant 0 : i32
    return %c0_i32, %c0_i32_0 : i32, i32
  }
  func.func @transform_4(%arg0: i32) -> (i32, i32) {
    %c0_i32 = arith.constant 0 : i32
    %c0_i32_0 = arith.constant 0 : i32
    %c0_i32_1 = arith.constant 0 : i32
    return %c0_i32, %c0_i32_0 : i32, i32
  }
  func.func @transform_5(%arg0: i32) -> (i32, i32, i32) {
    %c0_i32 = arith.constant 0 : i32
    %c0_i32_0 = arith.constant 0 : i32
    %c0_i32_1 = arith.constant 0 : i32
    %c0_i32_2 = arith.constant 0 : i32
    return %c0_i32, %c0_i32_0, %c0_i32_1 : i32, i32, i32
  }
  func.func @transform_6(%arg0: i32) -> (i32, i32) {
    %c0_i32 = arith.constant 0 : i32
    %c0_i32_0 = arith.constant 0 : i32
    %c0_i32_1 = arith.constant 0 : i32
    return %c0_i32, %c0_i32_0 : i32, i32
  }
  func.func @transform_7(%arg0: i32) -> (i32, i32) {
    %c0_i32 = arith.constant 0 : i32
    %c0_i32_0 = arith.constant 0 : i32
    %c0_i32_1 = arith.constant 0 : i32
    return %c0_i32, %c0_i32_0 : i32, i32
  }
  func.func @transform_8(%arg0: i32) -> (i32, i32, i32) {
    %c0_i32 = arith.constant 0 : i32
    %c0_i32_0 = arith.constant 0 : i32
    %c0_i32_1 = arith.constant 0 : i32
    return %arg0, %c0_i32, %c0_i32_0 : i32, i32, i32
  }
}

</mosaic_0001>

<bundles_post_ra>
// kernel: encoder_forward.1
= control target key start
LH: loop header
LB: loop body
LE: loop exit
PB: predicated region body
PF: predicated region fallthrough
CT: control target
= control target key end

     0   :  { %13 = vsyncpa [#allocation3], 0  ;;  %s6554_s0 = inlined_call_operand.vmem [shape: f32[2,8,3], index: 0, kind: input, shape index: {}]   ;;  %s6555_s1 = inlined_call_operand.vmem [shape: s8[2,6,8,8], index: 1, kind: input, shape index: {}]   ;;  %s6556_s2 = inlined_call_operand.vmem [shape: f32[3,256], index: 2, kind: input, shape index: {}]   ;;  %s6557_s3 = inlined_call_operand.vmem [shape: f32[1,256], index: 3, kind: input, shape index: {}]   ;;  %s6558_s4 = inlined_call_operand.hbm [shape: bf16[256,1152], index: 4, kind: input, shape index: {}]   ;;  %s6559_s5 = inlined_call_operand.hbm [shape: bf16[6,64,256], index: 5, kind: input, shape index: {}]   ;;  %s6560_s6 = inlined_call_operand.hbm [shape: bf16[256,256], index: 6, kind: input, shape index: {}]   ;;  %s6561_s7 = inlined_call_operand.hbm [shape: bf16[256,256], index: 7, kind: input, shape index: {}]   ;;  %s6562_s8 = inlined_call_operand.hbm [shape: f32[2,8,256], index: 8, kind: output, shape index: {}]  }
   0x1   :  { %14 = vsyncpa [#allocation6], 0 }
   0x2   :  { %15 = vsyncpa [#allocation9], 0 }
   0x3   :  { %16 = vsyncpa [#allocation4], 0  ;;  %s5755_s27 = smov [#allocation5]   ;;  %s5637_s9 = scalar_lea.hbm %s6559_s5, 6144 }
   0x4   :  { %s42_s28 = sshll.u32 %s5755_s27, 4  ;;  %p5638_p0 = scmp.ne.s32.totalorder %s6559_s5, %s5637_s9  ;;  %s43_s28 = int_to_ptr.vmem [resolvable:$true] %s42_s28 }
   0x5   :  { %p5641_p1 = scmp.lt.u32.totalorder %s5637_s9, %s6559_s5 }
   0x7   :  { %p5643_p2 = pnand %p5641_p1, %p5638_p0 }
   0x9   :  { %5646 = shalt.err (!%p5643_p2)
}
   0xa   :  { %s5647_s14 = scalar_lea.vmem %s43_s28, 6144  ;;  %p5652_p4 = scmp.lt.s32.totalorder %s43_s28, %s43_s28 }
   0xb   :  { %p5648_p3 = scmp.ne.s32.totalorder %s43_s28, %s5647_s14  ;;  %p5653_p5 = scmp.lt.s32.totalorder %s5647_s14, %s5647_s14 }
   0xd   :  { %p5654_p6 = por %p5653_p5, %p5652_p4 }
   0xf   :  { %p5655_p7 = pnand %p5654_p6, %p5648_p3 }
  0x11   :  { %5658 = shalt.err (!%p5655_p7)
}
  0x12   :  { %s5756_s15 = smov 128   ;;  %s5757_s16 = smov 8  }
  0x13   :  { %48 = dma.hbm_to_vmem [thread:$0]  %s6559_s5, 6144, %s43_s28, [#allocation6], %s5756_s15, %s5756_s15, %s5757_s16  }
  0x14   :  { %s5758_s19 = smov [#allocation2]   ;;  %s5659_s23 = scalar_lea.hbm %s6558_s4, 18432 }
  0x15   :  { %s30_s20 = sshll.u32 %s5758_s19, 4  ;;  %p5660_p8 = scmp.ne.s32.totalorder %s6558_s4, %s5659_s23  ;;  %s31_s20 = int_to_ptr.vmem [resolvable:$true] %s30_s20 }
  0x16   :  { %p5663_p9 = scmp.lt.u32.totalorder %s5659_s23, %s6558_s4 }
  0x18   :  { %p5665_p10 = pnand %p5663_p9, %p5660_p8 }
  0x1a   :  { %5668 = shalt.err (!%p5665_p10)
}
  0x1b   :  { %s5669_s29 = scalar_lea.vmem %s31_s20, 18432  ;;  %p5674_p12 = scmp.lt.s32.totalorder %s31_s20, %s31_s20 }
  0x1c   :  { %p5670_p11 = scmp.ne.s32.totalorder %s31_s20, %s5669_s29  ;;  %p5675_p13 = scmp.lt.s32.totalorder %s5669_s29, %s5669_s29 }
  0x1e   :  { %p5676_p0 = por %p5675_p13, %p5674_p12 }
  0x20   :  { %p5677_p1 = pnand %p5676_p0, %p5670_p11 }
  0x22   :  { %5680 = shalt.err (!%p5677_p1)
}
  0x23   :  { %s5759_s5 = smov 576   ;;  %s5760_s28 = smov 36  }
  0x24   :  { %36 = dma.hbm_to_vmem [thread:$0]  %s6558_s4, 18432, %s31_s20, [#allocation3], %s5759_s5, %s5759_s5, %s5760_s28  }
  0x25   :  { %s5761_s10 = smov [#allocation7]   ;;  %s5762_s12 = smov [#allocation8]  }
  0x26   :  { %s54_s11 = sshll.u32 %s5761_s10, 4  ;;  %s66_s13 = sshll.u32 %s5762_s12, 4  ;;  %s55_s11 = int_to_ptr.vmem [resolvable:$true] %s54_s11  ;;  %s5844_s13 = int_to_ptr.vmem [resolvable:$true] %s66_s13 }
  0x27   :  { %s5681_s18 = scalar_lea.hbm %s6560_s6, 4096 }
  0x28   :  { %p5682_p2 = scmp.ne.s32.totalorder %s6560_s6, %s5681_s18  ;;  %p5685_p3 = scmp.lt.u32.totalorder %s5681_s18, %s6560_s6 }
  0x2a   :  { %p5687_p4 = pnand %p5685_p3, %p5682_p2 }
  0x2c   :  { %5690 = shalt.err (!%p5687_p4)
}
  0x2d   :  { %s5691_s4 = scalar_lea.vmem %s55_s11, 4096  ;;  %p5696_p6 = scmp.lt.s32.totalorder %s55_s11, %s55_s11 }
  0x2e   :  { %p5692_p5 = scmp.ne.s32.totalorder %s55_s11, %s5691_s4  ;;  %p5697_p7 = scmp.lt.s32.totalorder %s5691_s4, %s5691_s4 }
  0x30   :  { %p5698_p8 = por %p5697_p7, %p5696_p6 }
  0x32   :  { %p5699_p9 = pnand %p5698_p8, %p5692_p5 }
  0x34   :  { %5702 = shalt.err (!%p5699_p9)
}
  0x35   :  { %60 = dma.hbm_to_vmem [thread:$0]  %s6560_s6, 4096, %s55_s11, [#allocation6], %s5756_s15, %s5756_s15, %s5757_s16  }
  0x36   :  { %s5703_s27 = scalar_lea.hbm %s6561_s7, 4096 }
  0x37   :  { %p5704_p10 = scmp.ne.s32.totalorder %s6561_s7, %s5703_s27  ;;  %p5707_p11 = scmp.lt.u32.totalorder %s5703_s27, %s6561_s7 }
  0x39   :  { %p5709_p12 = pnand %p5707_p11, %p5704_p10 }
  0x3b   :  { %5712 = shalt.err (!%p5709_p12)
}
  0x3c   :  { %s5713_s9 = scalar_lea.vmem %s5844_s13, 4096  ;;  %p5718_p0 = scmp.lt.s32.totalorder %s5844_s13, %s5844_s13 }
  0x3d   :  { %p5714_p13 = scmp.ne.s32.totalorder %s5844_s13, %s5713_s9  ;;  %p5719_p1 = scmp.lt.s32.totalorder %s5713_s9, %s5713_s9 }
  0x3f   :  { %p5720_p2 = por %p5719_p1, %p5718_p0 }
  0x41   :  { %p5721_p3 = pnand %p5720_p2, %p5714_p13 }
  0x43   :  { %5724 = shalt.err (!%p5721_p3)
}
  0x44   :  { %72 = dma.hbm_to_vmem [thread:$0]  %s6561_s7, 4096, %s5844_s13, [#allocation9], %s5756_s15, %s5756_s15, %s5757_s16  }
  0x45   :  { %5747 = dma.done.wait [#allocation3], 18432  }
  0x46   :  { %5748 = vsyncadd [#allocation3], 4294948864 }
  0x47   :  { %5749 = dma.done.wait [#allocation6], 10240  }
  0x48   :  { %5750 = vsyncadd [#allocation6], 4294957056 }
  0x49   :  { %5751 = dma.done.wait [#allocation9], 4096  }
  0x4a   :  { %5752 = vsyncadd [#allocation9], 4294963200  ;;  %v5763_v0 = vmov 1   ;;  %v5764_v1 = vmov 0   ;;  %v86_v2 = vld [vmem:[%s6554_s0] sm:$0xff]  ;;  %v87_v3 = vld [vmem:[%s6554_s0 + $0x8] sm:$0xff] }
  0x4b   :  { %5182 = vset.pattern.permute.xlu1 %v5763_v0  ;;  %5181 = vset.pattern.permute.xlu0 %v5764_v1  ;;  %v5185_v4 = vld [vmem:[#allocation2 + $0x4] ss:$36 sps:$4 sm:$0xff]   ;;  %v5187_v5 = vld [vmem:[#allocation2 + $0xc] ss:$36 sps:$4 sm:$0xff]   ;;  %v5193_v9 = vld [vmem:[#allocation2 + $0x54] ss:$36 sps:$4 sm:$0xff]  }
  0x4c   :  { %117 = vperm.xlu1 %5182, %v86_v2   ;;  %91 = vperm.xlu0 %5181, %v86_v2   ;;  %v5189_v6 = vld [vmem:[#allocation2] ss:$36 sps:$4 sm:$0xff]   ;;  %v5190_v7 = vld [vmem:[#allocation2 + $0x8] ss:$36 sps:$4 sm:$0xff]   ;;  %v5196_v11 = vld [vmem:[#allocation2 + $0x50] ss:$36 sps:$4 sm:$0xff]  }
  0x4d   :  { %1086 = vmatprep.subr.bf16.mxu0 %v5185_v4  ;;  %1129 = vmatprep.subr.bf16.mxu1 %v5187_v5  ;;  %v5191_v8 = vld [vmem:[#allocation2 + $0x4c] ss:$36 sps:$4 sm:$0xff]   ;;  %v5197_v12 = vld [vmem:[#allocation2 + $0x94] ss:$36 sps:$4 sm:$0xff]   ;;  %v5199_v13 = vld [vmem:[#allocation2 + $0x9c] ss:$36 sps:$4 sm:$0xff]  }
  0x4e   :  { %1087 = vmatpush1.bf16.msra.mxu0 %v5189_v6  ;;  %v5195_v10 = vld [vmem:[#allocation2 + $0x48] ss:$36 sps:$4 sm:$0xff]   ;;  %1130 = vmatpush1.bf16.msra.mxu1 %v5190_v7  ;;  %v5201_v14 = vld [vmem:[#allocation2 + $0x90] ss:$36 sps:$4 sm:$0xff]   ;;  %v5765_v15 = vmov 2   ;;  %vm5767_vm0 = vmmov 0  }
  0x4f   :  { %1088 = vmatprep.subr.bf16.mxu0 %v5191_v8  ;;  %1131 = vmatprep.subr.bf16.mxu1 %v5193_v9  ;;  %v5203_v16 = vld [vmem:[#allocation2 + $0xdc] ss:$36 sps:$4 sm:$0xff]   ;;  %v5205_v18 = vld [vmem:[#allocation2 + $0xe4] ss:$36 sps:$4 sm:$0xff]   ;;  %v5211_v22 = vld [vmem:[#allocation2 + $0x12c] ss:$36 sps:$4 sm:$0xff]   ;;  %v100_v8 = vlaneseq }
  0x50   :  { %121 = vperm.xlu1 %5182, %v87_v3   ;;  %96 = vperm.xlu0 %5181, %v87_v3   ;;  %v5202_v17 = vld [vmem:[#allocation2 + $0x98] ss:$36 sps:$4 sm:$0xff]   ;;  %v5209_v20 = vld [vmem:[#allocation2 + $0x124] ss:$36 sps:$4 sm:$0xff]   ;;  %v5215_v24 = vld [vmem:[#allocation2 + $0x16c] ss:$36 sps:$4 sm:$0xff]  }
  0x51   :  { %v5207_v19 = vld [vmem:[#allocation2 + $0xd8] ss:$36 sps:$4 sm:$0xff]   ;;  %v5208_v21 = vld [vmem:[#allocation2 + $0xe0] ss:$36 sps:$4 sm:$0xff]   ;;  %v5214_v25 = vld [vmem:[#allocation2 + $0x128] ss:$36 sps:$4 sm:$0xff]  }
  0x52   :  { %1089 = vmatpush1.bf16.msra.mxu0 %v5195_v10  ;;  %1132 = vmatpush1.bf16.msra.mxu1 %v5196_v11  ;;  %v5213_v23 = vld [vmem:[#allocation2 + $0x120] ss:$36 sps:$4 sm:$0xff]   ;;  %v5217_v26 = vld [vmem:[#allocation2 + $0x174] ss:$36 sps:$4 sm:$0xff]   ;;  %v5219_v27 = vld [vmem:[#allocation2 + $0x168] ss:$36 sps:$4 sm:$0xff]  }
  0x53   :  { %1090 = vmatprep.subr.bf16.mxu0 %v5197_v12  ;;  %1133 = vmatprep.subr.bf16.mxu1 %v5199_v13  ;;  %v5221_v28 = vld [vmem:[#allocation2 + $0x1b4] ss:$36 sps:$4 sm:$0xff]   ;;  %v5223_v30 = vld [vmem:[#allocation2 + $0x1bc] ss:$36 sps:$4 sm:$0xff]   ;;  %v5229_v34 = vld [vmem:[#allocation2 + $0x204] ss:$36 sps:$4 sm:$0xff]  }
  0x54   :  { %5184 = vset.pattern.permute.xlu1 %v5765_v15  ;;  %5183 = vset.pattern.permute.xlu0 %v5765_v15  ;;  %v5220_v29 = vld [vmem:[#allocation2 + $0x170] ss:$36 sps:$4 sm:$0xff]   ;;  %v5227_v32 = vld [vmem:[#allocation2 + $0x1fc] ss:$36 sps:$4 sm:$0xff]   ;;  %v5233_v36 = vld [vmem:[#allocation2 + $0x244] ss:$36 sps:$4 sm:$0xff]  }
  0x55   :  { %150 = vperm.xlu1 %5184, %v87_v3   ;;  %146 = vperm.xlu0 %5183, %v86_v2   ;;  %v5225_v31 = vld [vmem:[#allocation2 + $0x1b0] ss:$36 sps:$4 sm:$0xff]   ;;  %v5226_v33 = vld [vmem:[#allocation2 + $0x1b8] ss:$36 sps:$4 sm:$0xff]   ;;  %v5232_v37 = vld [vmem:[#allocation2 + $0x200] ss:$36 sps:$4 sm:$0xff]  }
  0x56   :  { %1091 = vmatpush1.bf16.msra.mxu0 %v5201_v14  ;;  %1134 = vmatpush1.bf16.msra.mxu1 %v5202_v17  ;;  %v5231_v35 = vld [vmem:[#allocation2 + $0x1f8] ss:$36 sps:$4 sm:$0xff]   ;;  %v5235_v38 = vld [vmem:[#allocation2 + $0x24c] ss:$36 sps:$4 sm:$0xff]   ;;  %v5237_v39 = vld [vmem:[#allocation2 + $0x240] ss:$36 sps:$4 sm:$0xff]  }
  0x57   :  { %1092 = vmatprep.subr.bf16.mxu0 %v5203_v16  ;;  %1135 = vmatprep.subr.bf16.mxu1 %v5205_v18  ;;  %v5239_v40 = vld [vmem:[#allocation2 + $0x28c] ss:$36 sps:$4 sm:$0xff]   ;;  %v5241_v42 = vld [vmem:[#allocation2 + $0x294] ss:$36 sps:$4 sm:$0xff]   ;;  %v5247_v46 = vld [vmem:[#allocation2 + $0x2dc] ss:$36 sps:$4 sm:$0xff]  }
  0x58   :  { %v5238_v41 = vld [vmem:[#allocation2 + $0x248] ss:$36 sps:$4 sm:$0xff]   ;;  %v5245_v44 = vld [vmem:[#allocation2 + $0x2d4] ss:$36 sps:$4 sm:$0xff]   ;;  %v5251_v48 = vld [vmem:[#allocation2 + $0x31c] ss:$36 sps:$4 sm:$0xff]  }
  0x59   :  { %v5243_v43 = vld [vmem:[#allocation2 + $0x288] ss:$36 sps:$4 sm:$0xff]   ;;  %v5244_v45 = vld [vmem:[#allocation2 + $0x290] ss:$36 sps:$4 sm:$0xff]   ;;  %v5250_v49 = vld [vmem:[#allocation2 + $0x2d8] ss:$36 sps:$4 sm:$0xff]  }
  0x5a   :  { %1093 = vmatpush1.bf16.msra.mxu0 %v5207_v19  ;;  %1136 = vmatpush1.bf16.msra.mxu1 %v5208_v21  ;;  %v5249_v47 = vld [vmem:[#allocation2 + $0x2d0] ss:$36 sps:$4 sm:$0xff]   ;;  %v5253_v50 = vld [vmem:[#allocation2 + $0x324] ss:$36 sps:$4 sm:$0xff]   ;;  %v5255_v51 = vld [vmem:[#allocation2 + $0x318] ss:$36 sps:$4 sm:$0xff]  }
  0x5b   :  { %1094 = vmatprep.subr.bf16.mxu0 %v5209_v20  ;;  %1137 = vmatprep.subr.bf16.mxu1 %v5211_v22  ;;  %v5257_v52 = vld [vmem:[#allocation2 + $0x364] ss:$36 sps:$4 sm:$0xff]   ;;  %v5259_v54 = vld [vmem:[#allocation2 + $0x36c] ss:$36 sps:$4 sm:$0xff]   ;;  %v5265_v58 = vld [vmem:[#allocation2 + $0x3b4] ss:$36 sps:$4 sm:$0xff]  }
  0x5c   :  { %v5256_v53 = vld [vmem:[#allocation2 + $0x320] ss:$36 sps:$4 sm:$0xff]   ;;  %v5263_v56 = vld [vmem:[#allocation2 + $0x3ac] ss:$36 sps:$4 sm:$0xff]   ;;  %v5269_v60 = vld [vmem:[#allocation2 + $0x3f4] ss:$36 sps:$4 sm:$0xff]  }
  0x5d   :  { %v5261_v55 = vld [vmem:[#allocation2 + $0x360] ss:$36 sps:$4 sm:$0xff]   ;;  %v5262_v57 = vld [vmem:[#allocation2 + $0x368] ss:$36 sps:$4 sm:$0xff]   ;;  %v5268_v61 = vld [vmem:[#allocation2 + $0x3b0] ss:$36 sps:$4 sm:$0xff]  }
  0x5e   :  { %1095 = vmatpush1.bf16.msra.mxu0 %v5213_v23  ;;  %1138 = vmatpush1.bf16.msra.mxu1 %v5214_v25  ;;  %v5267_v59 = vld [vmem:[#allocation2 + $0x3a8] ss:$36 sps:$4 sm:$0xff]   ;;  %v5271_v62 = vld [vmem:[#allocation2 + $0x3fc] ss:$36 sps:$4 sm:$0xff]   ;;  %v5273_v63 = vld [vmem:[#allocation2 + $0x3f0] ss:$36 sps:$4 sm:$0xff]  }
  0x5f   :  { %1096 = vmatprep.subr.bf16.mxu0 %v5215_v24  ;;  %1139 = vmatprep.subr.bf16.mxu1 %v5217_v26  ;;  %v5275_v0 = vld [vmem:[#allocation2 + $0x43c] ss:$36 sps:$4 sm:$0xff]   ;;  %v5277_v3 = vld [vmem:[#allocation2 + $0x444] ss:$36 sps:$4 sm:$0xff]   ;;  %v5283_v5 = vld [vmem:[#allocation2 + $0x14] ss:$36 sps:$4 sm:$0xff]  }
  0x60   :  { %v5274_v2 = vld [vmem:[#allocation2 + $0x3f8] ss:$36 sps:$4 sm:$0xff]   ;;  %v5280_v6 = vld [vmem:[#allocation2 + $0x440] ss:$36 sps:$4 sm:$0xff]   ;;  %v101_v9 = vshrl.u32 %v100_v8, 7  ;;  %vm1407_vm1 = vcmask 523264  }
  0x61   :  { %v5279_v4 = vld [vmem:[#allocation2 + $0x438] ss:$36 sps:$4 sm:$0xff]   ;;  %v4645_v10 = vld [vmem:[%s6556_s2 + $0x1] ss:$4 sm:$0x3]  ;;  %vm2308_vm3 = vcmask 64512  }
  0x62   :  { %1097 = vmatpush1.bf16.msra.mxu0 %v5219_v27  ;;  %1140 = vmatpush1.bf16.msra.mxu1 %v5220_v29  ;;  %v5286_v7 = vld [vmem:[#allocation2 + $0x1c] ss:$36 sps:$4 sm:$0xff]   ;;  %v102_v12 = vsub.s32 0, %v101_v9  ;;  %v106_v13 = vsub.s32 1, %v101_v9  ;;  %v5305_v9 = vld [vmem:[#allocation2 + $0x130] ss:$36 sps:$4 sm:$0xff]  }
  0x63   :  { %1098 = vmatprep.subr.bf16.mxu0 %v5221_v28  ;;  %1141 = vmatprep.subr.bf16.mxu1 %v5223_v30  ;;  %v88_v11 = vld [vmem:[%s6556_s2] ss:$4 sm:$0x3]  ;;  %v4646_v20 = vld [vmem:[%s6556_s2 + $0x2] ss:$4 sm:$0x3] }
  0x64   :  { %v128_v14 = vrot.slane %v4645_v10, %v102_v12  ;;  %v132_v15 = vrot.slane %v4645_v10, %v106_v13  ;;  %v103_v17 = vrot.slane %v88_v11, %v102_v12  ;;  %v107_v18 = vrot.slane %v88_v11, %v106_v13  ;;  %v172_v21 = vld [vmem:[%s6557_s3] sm:$0x3]  ;;  %v5308_v10 = vld [vmem:[#allocation2 + $0x138] ss:$36 sps:$4 sm:$0xff]   ;;  %s5768_s2 = smov 64  }
  0x65   :  { %v5310_v8 = vld [vmem:[#allocation2 + $0x13c] ss:$36 sps:$4 sm:$0xff]  }
  0x66   :  { %1099 = vmatpush1.bf16.msra.mxu0 %v5225_v31  ;;  %1142 = vmatpush1.bf16.msra.mxu1 %v5226_v33  ;;  %v161_v33 = vrot.slane %v4646_v20, %v106_v13  ;;  %v5313_v11 = vld [vmem:[#allocation2 + $0x17c] ss:$36 sps:$4 sm:$0xff]  }
  0x67   :  { %1100 = vmatprep.subr.bf16.mxu0 %v5227_v32  ;;  %1143 = vmatprep.subr.bf16.mxu1 %v5229_v34  ;;  %v157_v32 = vrot.slane %v4646_v20, %v102_v12  ;;  %v177_v34 = vrot.slane %v172_v21, %v102_v12  ;;  %v5316_v12 = vld [vmem:[#allocation2 + $0x184] ss:$36 sps:$4 sm:$0xff]   ;;  %v5328_v20 = vld [vmem:[#allocation2 + $0x214] ss:$36 sps:$4 sm:$0xff]  }
  0x6a   :  { %1101 = vmatpush1.bf16.msra.mxu0 %v5231_v35  ;;  %1144 = vmatpush1.bf16.msra.mxu1 %v5232_v37  ;;  %v181_v35 = vrot.slane %v172_v21, %v106_v13  ;;  %v5311_v13 = vld [vmem:[#allocation2 + $0x178] ss:$36 sps:$4 sm:$0xff]   ;;  %v5323_v21 = vld [vmem:[#allocation2 + $0x208] ss:$36 sps:$4 sm:$0xff]  }
  0x6b   :  { %1102 = vmatprep.subr.bf16.mxu0 %v5233_v36  ;;  %1145 = vmatprep.subr.bf16.mxu1 %v5235_v38 }
  0x6e   :  { %1103 = vmatpush1.bf16.msra.mxu0 %v5237_v39  ;;  %1146 = vmatpush1.bf16.msra.mxu1 %v5238_v41 }
  0x6f   :  { %1104 = vmatprep.subr.bf16.mxu0 %v5239_v40  ;;  %1147 = vmatprep.subr.bf16.mxu1 %v5241_v42 }
  0x72   :  { %1105 = vmatpush1.bf16.msra.mxu0 %v5243_v43  ;;  %1148 = vmatpush1.bf16.msra.mxu1 %v5244_v45 }
  0x73   :  { %1106 = vmatprep.subr.bf16.mxu0 %v5245_v44  ;;  %1149 = vmatprep.subr.bf16.mxu1 %v5247_v46 }
  0x76   :  { %1107 = vmatpush1.bf16.msra.mxu0 %v5249_v47  ;;  %1150 = vmatpush1.bf16.msra.mxu1 %v5250_v49 }
  0x77   :  { %1108 = vmatprep.subr.bf16.mxu0 %v5251_v48  ;;  %1151 = vmatprep.subr.bf16.mxu1 %v5253_v50 }
  0x7a   :  { %1109 = vmatpush1.bf16.msra.mxu0 %v5255_v51  ;;  %1152 = vmatpush1.bf16.msra.mxu1 %v5256_v53 }
  0x7b   :  { %1110 = vmatprep.subr.bf16.mxu0 %v5257_v52  ;;  %1153 = vmatprep.subr.bf16.mxu1 %v5259_v54 }
  0x7e   :  { %1111 = vmatpush1.bf16.msra.mxu0 %v5261_v55  ;;  %1154 = vmatpush1.bf16.msra.mxu1 %v5262_v57  ;;  %v5281_v55 = vld [vmem:[#allocation2 + $0x10] ss:$36 sps:$4 sm:$0xff]  }
  0x7f   :  { %1112 = vmatprep.subr.bf16.mxu0 %v5263_v56  ;;  %1155 = vmatprep.subr.bf16.mxu1 %v5265_v58  ;;  %v5284_v56 = vld [vmem:[#allocation2 + $0x18] ss:$36 sps:$4 sm:$0xff]  }
  0x80   :  { %v5289_v58 = vld [vmem:[#allocation2 + $0x5c] ss:$36 sps:$4 sm:$0xff]  }
  0x82   :  { %1113 = vmatpush1.bf16.msra.mxu0 %v5267_v59  ;;  %1156 = vmatpush1.bf16.msra.mxu1 %v5268_v61  ;;  %v5292_v59 = vld [vmem:[#allocation2 + $0x64] ss:$36 sps:$4 sm:$0xff]  }
  0x83   :  { %1114 = vmatprep.subr.bf16.mxu0 %v5269_v60  ;;  %1157 = vmatprep.subr.bf16.mxu1 %v5271_v62  ;;  %v5287_v60 = vld [vmem:[#allocation2 + $0x58] ss:$36 sps:$4 sm:$0xff]   ;;  %v5290_v61 = vld [vmem:[#allocation2 + $0x60] ss:$36 sps:$4 sm:$0xff]  }
  0x84   :  { %v5295_v62 = vld [vmem:[#allocation2 + $0xa4] ss:$36 sps:$4 sm:$0xff]  }
  0x86   :  { %1115 = vmatpush1.bf16.msra.mxu0 %v5273_v63  ;;  %1158 = vmatpush1.bf16.msra.mxu1 %v5274_v2  ;;  %v5298_v63 = vld [vmem:[#allocation2 + $0xac] ss:$36 sps:$4 sm:$0xff]  }
  0x87   :  { %1116 = vmatprep.subr.bf16.mxu0 %v5275_v0  ;;  %1159 = vmatprep.subr.bf16.mxu1 %v5277_v3  ;;  %v5293_v0 = vld [vmem:[#allocation2 + $0xa0] ss:$36 sps:$4 sm:$0xff]   ;;  %v5296_v2 = vld [vmem:[#allocation2 + $0xa8] ss:$36 sps:$4 sm:$0xff]  }
  0x88   :  { %v5301_v3 = vld [vmem:[#allocation2 + $0xec] ss:$36 sps:$4 sm:$0xff]  }
  0x8a   :  { %1117 = vmatpush1.bf16.msra.mxu0 %v5279_v4  ;;  %1160 = vmatpush1.bf16.msra.mxu1 %v5280_v6  ;;  %v5304_v4 = vld [vmem:[#allocation2 + $0xf4] ss:$36 sps:$4 sm:$0xff]  }
  0x8b   :  { %1172 = vmatprep.subr.bf16.mxu0 %v5283_v5  ;;  %1215 = vmatprep.subr.bf16.mxu1 %v5286_v7  ;;  %v5299_v5 = vld [vmem:[#allocation2 + $0xe8] ss:$36 sps:$4 sm:$0xff]   ;;  %v5302_v6 = vld [vmem:[#allocation2 + $0xf0] ss:$36 sps:$4 sm:$0xff]  }
  0x8c   :  { %v5307_v7 = vld [vmem:[#allocation2 + $0x134] ss:$36 sps:$4 sm:$0xff]  }
  0xcb   :  { %v118_v16 = vpop.permute.xlu1 %117  ;;  %v92_v19 = vpop.permute.xlu0 %91 }
  0xcc   :  { %v135_v22 = vmul.f32 %v128_v14, %v118_v16  ;;  %v136_v23 = vmul.f32 %v132_v15, %v118_v16  ;;  %v110_v24 = vmul.f32 %v103_v17, %v92_v19  ;;  %v111_v25 = vmul.f32 %v107_v18, %v92_v19  ;;  %v5322_v16 = vld [vmem:[#allocation2 + $0x1cc] ss:$36 sps:$4 sm:$0xff]  }
  0xcd   :  { %v5325_v19 = vld [vmem:[#allocation2 + $0x20c] ss:$36 sps:$4 sm:$0xff]  }
  0xce   :  { %v139_v36 = vadd.f32 %v135_v22, %v110_v24  ;;  %v140_v37 = vadd.f32 %v136_v23, %v111_v25  ;;  %v5326_v22 = vld [vmem:[#allocation2 + $0x210] ss:$36 sps:$4 sm:$0xff]   ;;  %v5334_v24 = vld [vmem:[#allocation2 + $0x25c] ss:$36 sps:$4 sm:$0xff]  }
  0xcf   :  { %v122_v26 = vpop.permute.xlu1 %121  ;;  %v97_v27 = vpop.permute.xlu0 %96  ;;  %v5331_v23 = vld [vmem:[#allocation2 + $0x254] ss:$36 sps:$4 sm:$0xff]  }
  0xd0   :  { %v137_v28 = vmul.f32 %v128_v14, %v122_v26  ;;  %v138_v29 = vmul.f32 %v132_v15, %v122_v26  ;;  %v112_v30 = vmul.f32 %v103_v17, %v97_v27  ;;  %v113_v31 = vmul.f32 %v107_v18, %v97_v27  ;;  %v5314_v14 = vld [vmem:[#allocation2 + $0x180] ss:$36 sps:$4 sm:$0xff]   ;;  %v5320_v18 = vld [vmem:[#allocation2 + $0x1c8] ss:$36 sps:$4 sm:$0xff]   ;;  %v5329_v25 = vld [vmem:[#allocation2 + $0x250] ss:$36 sps:$4 sm:$0xff]  }
  0xd1   :  { %v5319_v15 = vld [vmem:[#allocation2 + $0x1c4] ss:$36 sps:$4 sm:$0xff]   ;;  %v5332_v26 = vld [vmem:[#allocation2 + $0x258] ss:$36 sps:$4 sm:$0xff]  }
  0xd2   :  { %v141_v38 = vadd.f32 %v137_v28, %v112_v30  ;;  %v142_v39 = vadd.f32 %v138_v29, %v113_v31  ;;  %v5317_v17 = vld [vmem:[#allocation2 + $0x1c0] ss:$36 sps:$4 sm:$0xff]   ;;  %v5335_v29 = vld [vmem:[#allocation2 + $0x298] ss:$36 sps:$4 sm:$0xff]  }
  0xd3   :  { %v5337_v27 = vld [vmem:[#allocation2 + $0x29c] ss:$36 sps:$4 sm:$0xff]   ;;  %v5340_v28 = vld [vmem:[#allocation2 + $0x2a4] ss:$36 sps:$4 sm:$0xff]  }
  0xd4   :  { %v151_v40 = vpop.permute.xlu1 %150  ;;  %v147_v41 = vpop.permute.xlu0 %146  ;;  %v5338_v30 = vld [vmem:[#allocation2 + $0x2a0] ss:$36 sps:$4 sm:$0xff]  }
  0xd5   :  { %v166_v42 = vmul.f32 %v157_v32, %v151_v40  ;;  %v167_v43 = vmul.f32 %v161_v33, %v151_v40  ;;  %v164_v44 = vmul.f32 %v157_v32, %v147_v41  ;;  %v165_v45 = vmul.f32 %v161_v33, %v147_v41  ;;  %v5343_v31 = vld [vmem:[#allocation2 + $0x2e4] ss:$36 sps:$4 sm:$0xff]   ;;  %v5346_v32 = vld [vmem:[#allocation2 + $0x2ec] ss:$36 sps:$4 sm:$0xff]   ;;  %v5358_v40 = vld [vmem:[#allocation2 + $0x37c] ss:$36 sps:$4 sm:$0xff]  }
  0xd6   :  { %v5341_v33 = vld [vmem:[#allocation2 + $0x2e0] ss:$36 sps:$4 sm:$0xff]   ;;  %v5353_v41 = vld [vmem:[#allocation2 + $0x370] ss:$36 sps:$4 sm:$0xff]  }
  0xd7   :  { %v170_v46 = vadd.f32 %v166_v42, %v141_v38  ;;  %v171_v47 = vadd.f32 %v167_v43, %v142_v39  ;;  %v168_v48 = vadd.f32 %v164_v44, %v139_v36  ;;  %v169_v49 = vadd.f32 %v165_v45, %v140_v37  ;;  %v5352_v36 = vld [vmem:[#allocation2 + $0x334] ss:$36 sps:$4 sm:$0xff]   ;;  %v5347_v37 = vld [vmem:[#allocation2 + $0x328] ss:$36 sps:$4 sm:$0xff]   ;;  %v5361_v43 = vld [vmem:[#allocation2 + $0x3bc] ss:$36 sps:$4 sm:$0xff]  }
  0xd8   :  { %v5350_v38 = vld [vmem:[#allocation2 + $0x330] ss:$36 sps:$4 sm:$0xff]   ;;  %v5356_v42 = vld [vmem:[#allocation2 + $0x378] ss:$36 sps:$4 sm:$0xff]   ;;  %v5364_v44 = vld [vmem:[#allocation2 + $0x3c4] ss:$36 sps:$4 sm:$0xff]  }
  0xd9   :  { %v5900_v50 = vadd.f32 %v177_v34, %v170_v46  ;;  %v5902_v51 = vadd.f32 %v181_v35, %v171_v47  ;;  %v5904_v52 = vadd.f32 %v177_v34, %v168_v48  ;;  %v5906_v53 = vadd.f32 %v181_v35, %v169_v49  ;;  %v5344_v34 = vld [vmem:[#allocation2 + $0x2e8] ss:$36 sps:$4 sm:$0xff]   ;;  %v5355_v39 = vld [vmem:[#allocation2 + $0x374] ss:$36 sps:$4 sm:$0xff]   ;;  %v5362_v46 = vld [vmem:[#allocation2 + $0x3c0] ss:$36 sps:$4 sm:$0xff]  }
  0xda   :  { %v5349_v35 = vld [vmem:[#allocation2 + $0x32c] ss:$36 sps:$4 sm:$0xff]   ;;  %v5359_v45 = vld [vmem:[#allocation2 + $0x3b8] ss:$36 sps:$4 sm:$0xff]   ;;  %v5367_v47 = vld [vmem:[#allocation2 + $0x404] ss:$36 sps:$4 sm:$0xff]  }
  0xdb   :  { %v5910_v54 = vpack.c.bf16 %v5902_v51, %v5906_v53  ;;  %v5914_v57 = vpack.c.bf16 %v5900_v50, %v5904_v52  ;;  %v5370_v48 = vld [vmem:[#allocation2 + $0x40c] ss:$36 sps:$4 sm:$0xff]   ;;  %v5365_v49 = vld [vmem:[#allocation2 + $0x400] ss:$36 sps:$4 sm:$0xff]  }
  0xdd   :  { %1118 = vmatprep.mubr.bf16.mxu0 %v5910_v54  ;;  %1161 = vmatprep.mubr.bf16.mxu1 %v5910_v54 }
  0xde   :  { %1119 = vmatmul.mubr.bf16.vlgmr.msra.gmra.mrb[0].mxu0 %v5914_v57  ;;  %1162 = vmatmul.mubr.bf16.vlgmr.msra.gmra.mrb[0].mxu1 %v5914_v57 }
  0xdf   :  { %1173 = vmatpush1.bf16.msra.mxu0 %v5281_v55  ;;  %1216 = vmatpush1.bf16.msra.mxu1 %v5284_v56  ;;  %v5368_v55 = vld [vmem:[#allocation2 + $0x408] ss:$36 sps:$4 sm:$0xff]  }
  0xe0   :  { %1204 = vmatprep.mubr.bf16.mxu0 %v5910_v54  ;;  %1247 = vmatprep.mubr.bf16.mxu1 %v5910_v54  ;;  %v5373_v56 = vld [vmem:[#allocation2 + $0x44c] ss:$36 sps:$4 sm:$0xff]  }
  0xe1   :  { %1174 = vmatprep.subr.bf16.mxu0 %v5289_v58  ;;  %1217 = vmatprep.subr.bf16.mxu1 %v5292_v59  ;;  %v5376_v58 = vld [vmem:[#allocation2 + $0x454] ss:$36 sps:$4 sm:$0xff]   ;;  %v5371_v59 = vld [vmem:[#allocation2 + $0x448] ss:$36 sps:$4 sm:$0xff]  }
  0xe3   :  { %1175 = vmatpush1.bf16.msra.mxu0 %v5287_v60  ;;  %1218 = vmatpush1.bf16.msra.mxu1 %v5290_v61  ;;  %v5374_v60 = vld [vmem:[#allocation2 + $0x450] ss:$36 sps:$4 sm:$0xff]   ;;  %v5377_v61 = vld [vmem:[#allocation2 + $0x260] ss:$36 sps:$4 sm:$0xff]  }
  0xe4   :  { %1176 = vmatprep.subr.bf16.mxu0 %v5295_v62  ;;  %1219 = vmatprep.subr.bf16.mxu1 %v5298_v63  ;;  %v5378_v62 = vld [vmem:[#allocation2 + $0x20] ss:$36 sps:$4 sm:$0xff]   ;;  %v5379_v63 = vld [vmem:[#allocation2 + $0x2a8] ss:$36 sps:$4 sm:$0xff]  }
  0xe7   :  { %1177 = vmatpush1.bf16.msra.mxu0 %v5293_v0  ;;  %1220 = vmatpush1.bf16.msra.mxu1 %v5296_v2  ;;  %v5380_v0 = vld [vmem:[#allocation2 + $0x68] ss:$36 sps:$4 sm:$0xff]   ;;  %v5381_v2 = vld [vmem:[#allocation2 + $0x2f0] ss:$36 sps:$4 sm:$0xff]  }
  0xe8   :  { %1178 = vmatprep.subr.bf16.mxu0 %v5301_v3  ;;  %1221 = vmatprep.subr.bf16.mxu1 %v5304_v4  ;;  %v5382_v3 = vld [vmem:[#allocation2 + $0xb0] ss:$36 sps:$4 sm:$0xff]   ;;  %v5383_v4 = vld [vmem:[#allocation2 + $0x338] ss:$36 sps:$4 sm:$0xff]  }
  0xeb   :  { %1179 = vmatpush1.bf16.msra.mxu0 %v5299_v5  ;;  %1222 = vmatpush1.bf16.msra.mxu1 %v5302_v6  ;;  %v5384_v5 = vld [vmem:[#allocation2 + $0xf8] ss:$36 sps:$4 sm:$0xff]   ;;  %v5385_v6 = vld [vmem:[#allocation2 + $0x380] ss:$36 sps:$4 sm:$0xff]  }
  0xec   :  { %1180 = vmatprep.subr.bf16.mxu0 %v5307_v7  ;;  %1223 = vmatprep.subr.bf16.mxu1 %v5310_v8  ;;  %v5386_v7 = vld [vmem:[#allocation2 + $0x140] ss:$36 sps:$4 sm:$0xff]   ;;  %v5387_v8 = vld [vmem:[#allocation2 + $0x3c8] ss:$36 sps:$4 sm:$0xff]  }
  0xef   :  { %1181 = vmatpush1.bf16.msra.mxu0 %v5305_v9  ;;  %1224 = vmatpush1.bf16.msra.mxu1 %v5308_v10  ;;  %v5388_v9 = vld [vmem:[#allocation2 + $0x188] ss:$36 sps:$4 sm:$0xff]   ;;  %v5389_v10 = vld [vmem:[#allocation2 + $0x410] ss:$36 sps:$4 sm:$0xff]  }
  0xf0   :  { %1182 = vmatprep.subr.bf16.mxu0 %v5313_v11  ;;  %1225 = vmatprep.subr.bf16.mxu1 %v5316_v12  ;;  %v5766_v11 = vmov 0.0   ;;  %v5391_v12 = vld [vmem:[#allocation2 + $0x458] ss:$36 sps:$4 sm:$0xff]  }
  0xf3   :  { %1183 = vmatpush1.bf16.msra.mxu0 %v5311_v13  ;;  %1226 = vmatpush1.bf16.msra.mxu1 %v5314_v14  ;;  %v5392_v13 = vld [vmem:[#allocation2 + $0x218] ss:$36 sps:$4 sm:$0xff]  }
  0xf4   :  { %1184 = vmatprep.subr.bf16.mxu0 %v5319_v15  ;;  %1227 = vmatprep.subr.bf16.mxu1 %v5322_v16 }
  0xf7   :  { %1185 = vmatpush1.bf16.msra.mxu0 %v5317_v17  ;;  %1228 = vmatpush1.bf16.msra.mxu1 %v5320_v18 }
  0xf8   :  { %1186 = vmatprep.subr.bf16.mxu0 %v5325_v19  ;;  %1229 = vmatprep.subr.bf16.mxu1 %v5328_v20 }
  0xfb   :  { %1187 = vmatpush1.bf16.msra.mxu0 %v5323_v21  ;;  %1230 = vmatpush1.bf16.msra.mxu1 %v5326_v22 }
  0xfc   :  { %1188 = vmatprep.subr.bf16.mxu0 %v5331_v23  ;;  %1231 = vmatprep.subr.bf16.mxu1 %v5334_v24 }
  0xff   :  { %1189 = vmatpush1.bf16.msra.mxu0 %v5329_v25  ;;  %1232 = vmatpush1.bf16.msra.mxu1 %v5332_v26 }
 0x100   :  { %1190 = vmatprep.subr.bf16.mxu0 %v5337_v27  ;;  %1233 = vmatprep.subr.bf16.mxu1 %v5340_v28 }
 0x103   :  { %1191 = vmatpush1.bf16.msra.mxu0 %v5335_v29  ;;  %1234 = vmatpush1.bf16.msra.mxu1 %v5338_v30 }
 0x104   :  { %1192 = vmatprep.subr.bf16.mxu0 %v5343_v31  ;;  %1235 = vmatprep.subr.bf16.mxu1 %v5346_v32 }
 0x107   :  { %1193 = vmatpush1.bf16.msra.mxu0 %v5341_v33  ;;  %1236 = vmatpush1.bf16.msra.mxu1 %v5344_v34 }
 0x108   :  { %1194 = vmatprep.subr.bf16.mxu0 %v5349_v35  ;;  %1237 = vmatprep.subr.bf16.mxu1 %v5352_v36 }
 0x10b   :  { %1195 = vmatpush1.bf16.msra.mxu0 %v5347_v37  ;;  %1238 = vmatpush1.bf16.msra.mxu1 %v5350_v38 }
 0x10c   :  { %1196 = vmatprep.subr.bf16.mxu0 %v5355_v39  ;;  %1239 = vmatprep.subr.bf16.mxu1 %v5358_v40 }
 0x10f   :  { %1197 = vmatpush1.bf16.msra.mxu0 %v5353_v41  ;;  %1240 = vmatpush1.bf16.msra.mxu1 %v5356_v42 }
 0x110   :  { %1198 = vmatprep.subr.bf16.mxu0 %v5361_v43  ;;  %1241 = vmatprep.subr.bf16.mxu1 %v5364_v44 }
 0x113   :  { %1199 = vmatpush1.bf16.msra.mxu0 %v5359_v45  ;;  %1242 = vmatpush1.bf16.msra.mxu1 %v5362_v46 }
 0x114   :  { %1200 = vmatprep.subr.bf16.mxu0 %v5367_v47  ;;  %1243 = vmatprep.subr.bf16.mxu1 %v5370_v48  ;;  %v6027_v47 = vld [vmem:[%s6555_s1] sm:$0xff]  }
 0x115   :  { %v4947_v48 = vunpack.c.0.s8 %v6027_v47 }
 0x117   :  { %1201 = vmatpush1.bf16.msra.mxu0 %v5365_v49  ;;  %1244 = vmatpush1.bf16.msra.mxu1 %v5368_v55  ;;  %v6033_v49 = vld [vmem:[%s6555_s1 + $0xc] sm:$0xff]   ;;  %v6035_v55 = vcvt.s32.f32 %v4947_v48 }
 0x118   :  { %1202 = vmatprep.subr.bf16.mxu0 %v5373_v56  ;;  %1245 = vmatprep.subr.bf16.mxu1 %v5376_v58  ;;  %v4959_v56 = vunpack.c.0.s8 %v6033_v49 }
 0x119   :  { %vm1395_vm2 = vcmp.eq.f32.partialorder %v6035_v55, 0.0 }
 0x11a   :  { %v6039_v58 = vcvt.s32.f32 %v4959_v56 }
 0x11b   :  { %1203 = vmatpush1.bf16.msra.mxu0 %v5371_v59  ;;  %1246 = vmatpush1.bf16.msra.mxu1 %v5374_v60 }
 0x11c   :  { %4969 = vmatprep.subr.bf16.mxu0 %v5377_v61  ;;  %5039 = vmatprep.subr.mxu1 %v5766_v11  ;;  %vm1396_vm4 = vcmp.eq.f32.partialorder %v6039_v58, 0.0 }
 0x11e   :  { %1205 = vmatmul.mubr.bf16.vlgmr.msra.gmra.mrb[4].mxu0 %v5914_v57  ;;  %1248 = vmatmul.mubr.bf16.vlgmr.msra.gmra.mrb[4].mxu1 %v5914_v57 }
 0x11f   :  { %4970 = vmatpush3.bf16.msra.mxu0 %v5378_v62  ;;  %1290 = vmatprep.mubr.bf16.mxu0 %v5910_v54  ;;  %v5390_v54 = vld [vmem:[#allocation2 + $0x1d0] ss:$36 sps:$4 sm:$0xff]  }
 0x120   :  { %4971 = vmatprep.subr.bf16.mxu0 %v5379_v63  ;;  %5041 = vmatprep.mubr.msk.f32.mxu1 %vm5767_vm0, %v5766_v11 }
 0x123   :  { %4972 = vmatpush3.bf16.msra.mxu0 %v5380_v0 }
 0x124   :  { %4973 = vmatprep.subr.bf16.mxu0 %v5381_v2 }
 0x127   :  { %4974 = vmatpush3.bf16.msra.mxu0 %v5382_v3 }
 0x128   :  { %4975 = vmatprep.subr.bf16.mxu0 %v5383_v4  ;;  %v6051_v4 = vld [vmem:[%s6555_s1 + $0x8] ss:$12 sps:$4 sm:$0xff]   ;;  %s5769_s1 = smov [#allocation10]  }
 0x129   :  { %s4631_s25 = sshll.u32 %s5769_s1, 4  ;;  %s4632_s25 = int_to_ptr.vmem [resolvable:$true] %s4631_s25 }
 0x12a   :  { %s5725_s26 = scalar_lea.vmem %s4632_s25, 512  ;;  %p5730_p5 = scmp.lt.s32.totalorder %s4632_s25, %s4632_s25 }
 0x12b   :  { %4976 = vmatpush3.bf16.msra.mxu0 %v5384_v5  ;;  %v4955_v5 = vunpack.c.0.s8 %v6051_v4  ;;  %p5726_p4 = scmp.ne.s32.totalorder %s4632_s25, %s5725_s26  ;;  %p5731_p6 = scmp.lt.s32.totalorder %s5725_s26, %s5725_s26 }
 0x12c   :  { %4977 = vmatprep.subr.bf16.mxu0 %v5385_v6 }
 0x12d   :  { %v6054_v6 = vcvt.s32.f32 %v4955_v5  ;;  %p5732_p7 = por %p5731_p6, %p5730_p5 }
 0x12f   :  { %4978 = vmatpush3.bf16.msra.mxu0 %v5386_v7  ;;  %vm1403_vm5 = vcmp.eq.f32.partialorder %v6054_v6, 0.0  ;;  %p5733_p8 = pnand %p5732_p7, %p5726_p4 }
 0x130   :  { %4979 = vmatprep.subr.bf16.mxu0 %v5387_v8 }
 0x133   :  { %4980 = vmatpush3.bf16.msra.mxu0 %v5388_v9 }
 0x134   :  { %4981 = vmatprep.subr.bf16.mxu0 %v5389_v10 }
 0x137   :  { %4982 = vmatpush3.bf16.msra.mxu0 %v5390_v54  ;;  %v4948_v54 = vunpack.c.1.s8 %v6027_v47 }
 0x138   :  { %4983 = vmatprep.subr.bf16.mxu0 %v5391_v12 }
 0x139   :  { %v6064_v12 = vcvt.s32.f32 %v4948_v54 }
 0x13b   :  { %4984 = vmatpush3.bf16.msra.mxu0 %v5392_v13  ;;  %v4960_v13 = vunpack.c.1.s8 %v6033_v49  ;;  %vm1397_vm6 = vcmp.eq.f32.partialorder %v6064_v12, 0.0 }
 0x13c   :  { %5079 = vmatprep.subr.mxu0 %v5766_v11 }
 0x13e   :  { %1291 = vmatmul.mubr.bf16.vlgmr.msra.gmra.mrb[8].mxu0 %v5914_v57 }
 0x13f   :  { %5081 = vmatprep.mubr.msk.f32.mxu0 %vm5767_vm0, %v5766_v11 }
 0x1b1   :  { %v1120_v14 = vpop.f32.mrb[0].mxu0  ;;  %v1163_v15 = vpop.f32.mrb[0].mxu1 }
 0x1b2   :  { %v1165_v16 = vpop.f32.mrb[1].mxu1  ;;  %1301 = vrot.lane.b32.xlu0 %v1120_v14, %s5768_s2  ;;  %v1122_v17 = vpop.f32.mrb[1].mxu0 }
 0x1b3   :  { %1319 = vrot.lane.b32.xlu1 %v1165_v16, %s5768_s2  ;;  %v1124_v18 = vpop.f32.mrb[2].mxu0  ;;  %v5934_v19 = vpop.f32.mrb[2].mxu1  ;;  %5040 = vmatpush3.xpose.msk.msra.mxu1 %vm1407_vm1, %v1165_v16 }
 0x1b4   :  { %v1126_v20 = vpop.f32.mrb[3].mxu0  ;;  %v1169_v57 = vpop.f32.mrb[3].mxu1  ;;  %5044 = vmatprep.subr.mxu1 %v5766_v11 }
 0x1b6   :  { %5042 = vmatmul.mubr.msk.f32.vlgmr.msra.gmra.mrb[8].mxu1 %vm1407_vm1, %v1120_v14  ;;  %1303 = vrot.lane.b32.xlu0 %v1124_v18, %s5768_s2  ;;  %v6068_v14 = vcvt.s32.f32 %v4960_v13 }
 0x1b7   :  { %1321 = vrot.lane.b32.xlu1 %v1169_v57, %s5768_s2  ;;  %5045 = vmatpush3.xpose.msk.msra.mxu1 %vm1407_vm1, %v1169_v57  ;;  %v4963_v57 = vunpack.c.2.s8 %v6033_v49 }
 0x1b8   :  { %5046 = vmatprep.mubr.msk.f32.mxu1 %vm5767_vm0, %v5766_v11  ;;  %5049 = vmatprep.subr.mxu1 %v5766_v11  ;;  %vm1398_vm7 = vcmp.eq.f32.partialorder %v6068_v14, 0.0 }
 0x1ba   :  { %1307 = vrot.lane.b32.xlu0 %v1122_v17, %s5768_s2  ;;  %5047 = vmatmul.mubr.msk.f32.vlgmr.msra.gmra.mrb[10].mxu1 %vm1407_vm1, %v1124_v18 }
 0x1bb   :  { %5051 = vmatprep.mubr.msk.f32.mxu1 %vm5767_vm0, %v5766_v11 }
 0x1be   :  { %1309 = vrot.lane.b32.xlu0 %v1126_v20, %s5768_s2 }
 0x1f1   :  { %v1206_v21 = vpop.f32.mrb[4].mxu0  ;;  %v5950_v22 = vpop.f32.mrb[4].mxu1 }
 0x1f2   :  { %v5952_v23 = vpop.f32.mrb[5].mxu1  ;;  %1325 = vrot.lane.b32.xlu1 %v1206_v21, %s5768_s2  ;;  %v1208_v24 = vpop.f32.mrb[5].mxu0 }
 0x1f3   :  { %v1210_v25 = vpop.f32.mrb[6].mxu0  ;;  %v5955_v26 = vpop.f32.mrb[6].mxu1  ;;  %5080 = vmatpush3.xpose.msk.msra.mxu0 %vm1407_vm1, %v1208_v24 }
 0x1f4   :  { %v1212_v27 = vpop.f32.mrb[7].mxu0  ;;  %v5958_v28 = vpop.f32.mrb[7].mxu1  ;;  %5089 = vmatprep.subr.mxu0 %v5766_v11 }
 0x1f5   :  { %1333 = vrot.lane.b32.xlu0 %v1212_v27, %s5768_s2 }
 0x1f6   :  { %5082 = vmatmul.mubr.msk.f32.vlgmr.msra.gmra.mrb[12].mxu0 %vm1407_vm1, %v1163_v15  ;;  %1327 = vrot.lane.b32.xlu1 %v1210_v25, %s5768_s2 }
 0x1f7   :  { %5091 = vmatprep.mubr.msk.f32.mxu0 %vm5767_vm0, %v5766_v11 }
 0x1f9   :  { %1315 = vrot.lane.b32.xlu0 %v5934_v19, %s5768_s2 }
 0x1fa   :  { %1331 = vrot.lane.b32.xlu1 %v1208_v24, %s5768_s2 }
 0x1fe   :  { %1313 = vrot.lane.b32.xlu1 %v1163_v15, %s5768_s2  ;;  %v4951_v15 = vunpack.c.2.s8 %v6027_v47 }
 0x211   :  { %v4985_v29 = vpop.f32.mrb[8].mxu0 }
 0x212   :  { %v4986_v30 = vpop.f32.mrb[9].mxu0 }
 0x213   :  { %v5970_v31 = vadd.f32 %v4986_v30, %v4985_v29  ;;  %v4988_v32 = vpop.f32.mrb[10].mxu0  ;;  %v6088_v29 = vcvt.s32.f32 %v4963_v57 }
 0x214   :  { %v4989_v33 = vpop.f32.mrb[11].mxu0 }
 0x215   :  { %v5972_v34 = vadd.f32 %v4989_v33, %v4988_v32  ;;  %vm1400_vm9 = vcmp.eq.f32.partialorder %v6088_v29, 0.0 }
 0x224   :  { %v1302_v36 = vpop.permute.xlu0 %1301 }
 0x225   :  { %v1320_v35 = vpop.permute.xlu1 %1319 }
 0x226   :  { %5050 = vmatpush3.xpose.msk.msra.mxu1 %vm1407_vm1, %v1320_v35 }
 0x227   :  { %5054 = vmatprep.subr.mxu1 %v5766_v11 }
 0x228   :  { %v1304_v38 = vpop.permute.xlu0 %1303 }
 0x229   :  { %v1322_v37 = vpop.permute.xlu1 %1321  ;;  %5052 = vmatmul.mubr.msk.f32.vlgmr.msra.gmra.mrb[12].mxu1 %vm1407_vm1, %v1302_v36 }
 0x22a   :  { %5055 = vmatpush3.xpose.msk.msra.mxu1 %vm1407_vm1, %v1322_v37  ;;  %5056 = vmatprep.mubr.msk.f32.mxu1 %vm5767_vm0, %v5766_v11 }
 0x22b   :  { %5059 = vmatprep.subr.mxu1 %v5766_v11 }
 0x22c   :  { %v1308_v39 = vpop.permute.xlu0 %1307 }
 0x22d   :  { %5057 = vmatmul.mubr.msk.f32.vlgmr.msra.gmra.mrb[14].mxu1 %vm1407_vm1, %v1304_v38 }
 0x22e   :  { %5060 = vmatpush3.xpose.msk.msra.mxu1 %vm1407_vm1, %v1206_v21  ;;  %5061 = vmatprep.mubr.msk.f32.mxu1 %vm5767_vm0, %v5766_v11 }
 0x22f   :  { %5064 = vmatprep.subr.mxu1 %v5766_v11 }
 0x230   :  { %v1310_v42 = vpop.permute.xlu0 %1309 }
 0x231   :  { %5062 = vmatmul.mubr.msk.f32.vlgmr.msra.gmra.mrb[16].mxu1 %vm1407_vm1, %v1122_v17 }
 0x232   :  { %5065 = vmatpush3.xpose.msk.msra.mxu1 %vm1407_vm1, %v1210_v25  ;;  %5066 = vmatprep.mubr.msk.f32.mxu1 %vm5767_vm0, %v5766_v11 }
 0x233   :  { %5069 = vmatprep.subr.mxu1 %v5766_v11 }
 0x235   :  { %5067 = vmatmul.mubr.msk.f32.vlgmr.msra.gmra.mrb[18].mxu1 %vm1407_vm1, %v1126_v20  ;;  %v6078_v20 = vcvt.s32.f32 %v4951_v15 }
 0x236   :  { %5071 = vmatprep.mubr.msk.f32.mxu1 %vm5767_vm0, %v5766_v11 }
 0x237   :  { %vm1399_vm8 = vcmp.eq.f32.partialorder %v6078_v20, 0.0 }
 0x264   :  { %v1326_v40 = vpop.permute.xlu1 %1325 }
 0x265   :  { %5070 = vmatpush3.xpose.msk.msra.mxu1 %vm1407_vm1, %v1326_v40 }
 0x266   :  { %5074 = vmatprep.subr.mxu1 %v5766_v11 }
 0x267   :  { %v1334_v44 = vpop.permute.xlu0 %1333 }
 0x268   :  { %v1328_v41 = vpop.permute.xlu1 %1327  ;;  %5072 = vmatmul.mubr.msk.f32.vlgmr.msra.gmra.mrb[20].mxu1 %vm1407_vm1, %v1308_v39 }
 0x269   :  { %5075 = vmatpush3.xpose.msk.msra.mxu1 %vm1407_vm1, %v1328_v41  ;;  %5076 = vmatprep.mubr.msk.f32.mxu1 %vm5767_vm0, %v5766_v11 }
 0x26a   :  { %5084 = vmatprep.subr.mxu1 %v5766_v11 }
 0x26b   :  { %v1316_v46 = vpop.permute.xlu0 %1315 }
 0x26c   :  { %v1332_v43 = vpop.permute.xlu1 %1331  ;;  %5077 = vmatmul.mubr.msk.f32.vlgmr.msra.gmra.mrb[22].mxu1 %vm1407_vm1, %v1310_v42 }
 0x26d   :  { %5085 = vmatpush3.xpose.msk.msra.mxu1 %vm1407_vm1, %v1212_v27  ;;  %5090 = vmatpush3.xpose.msk.msra.mxu0 %vm1407_vm1, %v1332_v43 }
 0x26e   :  { %5086 = vmatprep.mubr.msk.f32.mxu1 %vm5767_vm0, %v5766_v11  ;;  %5099 = vmatprep.subr.mxu0 %v5766_v11 }
 0x26f   :  { %5094 = vmatprep.subr.mxu1 %v5766_v11 }
 0x270   :  { %v1314_v45 = vpop.permute.xlu1 %1313  ;;  %5087 = vmatmul.mubr.msk.f32.vlgmr.msra.gmra.mrb[24].mxu1 %vm1407_vm1, %v5934_v19 }
 0x271   :  { %5092 = vmatmul.mubr.msk.f32.vlgmr.msra.gmra.mrb[14].mxu0 %vm1407_vm1, %v1314_v45  ;;  %5095 = vmatpush3.xpose.msk.msra.mxu1 %vm1407_vm1, %v1334_v44 }
 0x272   :  { %5100 = vmatpush3.msra.mxu0 %v5950_v22  ;;  %5096 = vmatprep.mubr.msk.f32.mxu1 %vm5767_vm0, %v5766_v11 }
 0x273   :  { %5104 = vmatprep.subr.mxu1 %v5766_v11  ;;  %5101 = vmatprep.mubr.msk.f32.mxu0 %vm5767_vm0, %v5766_v11 }
 0x274   :  { %5097 = vmatmul.mubr.msk.f32.vlgmr.msra.gmra.mrb[26].mxu1 %vm1407_vm1, %v1316_v46  ;;  %5109 = vmatprep.subr.mxu0 %v5766_v11 }
 0x275   :  { %5105 = vmatpush3.msra.mxu1 %v5955_v26  ;;  %5106 = vmatprep.mubr.msk.f32.mxu1 %vm5767_vm0, %v5766_v11 }
 0x276   :  { %5114 = vmatprep.subr.mxu1 %v5766_v11 }
 0x289   :  { %v1478_v59 = vpop.f32.mrb[8].mxu1 }
 0x28a   :  { %v2296_v60 = vsel %vm1395_vm2, -1e+09, %v1478_v59  ;;  %v5043_v61 = vpop.f32.mrb[9].mxu1 }
 0x28b   :  { %v2309_v62 = vsel %vm2308_vm3, %v2296_v60, -inf }
 0x28c   :  { %2310 = vmax.xlane.f32.xlu1 %v2309_v62  ;;  %v4964_v62 = vunpack.c.3.s8 %v6033_v49 }
 0x28d   :  { %v1552_v63 = vpop.f32.mrb[10].mxu1 }
 0x28e   :  { %v2297_v0 = vsel %vm1396_vm4, -1e+09, %v1552_v63  ;;  %v5048_v2 = vpop.f32.mrb[11].mxu1  ;;  %v6116_v63 = vcvt.s32.f32 %v4964_v62 }
 0x28f   :  { %v2312_v3 = vsel %vm2308_vm3, %v2297_v0, -inf  ;;  %v4956_v2 = vunpack.c.1.s8 %v6051_v4 }
 0x290   :  { %2313 = vmax.xlane.f32.xlu0 %v2312_v3  ;;  %vm1402_vm11 = vcmp.eq.f32.partialorder %v6116_v63, 0.0 }
 0x2c9   :  { %v2070_v7 = vpop.f32.mrb[12].mxu0 }
 0x2ca   :  { %v6059_v8 = vsel %vm1403_vm5, -1e+09, %v2070_v7  ;;  %v5083_v9 = vpop.f32.mrb[13].mxu0 }
 0x2cb   :  { %v2333_v10 = vsel %vm2308_vm3, %v6059_v8, -inf  ;;  %v4968_v9 = vunpack.c.3.s8 %v6051_v4 }
 0x2cc   :  { %2334 = vmax.xlane.f32.xlu0 %v2333_v10  ;;  %v6130_v10 = vcvt.s32.f32 %v4956_v2 }
 0x2ce   :  { %vm1405_vm13 = vcmp.eq.f32.partialorder %v6130_v10, 0.0 }
 0x2fc   :  { %v1626_v16 = vpop.f32.mrb[12].mxu1 }
 0x2fd   :  { %v6073_v17 = vsel %vm1397_vm6, -1e+09, %v1626_v16  ;;  %v5053_v18 = vpop.f32.mrb[13].mxu1 }
 0x2fe   :  { %v2315_v19 = vsel %vm2308_vm3, %v6073_v17, -inf  ;;  %v6139_v18 = vcvt.s32.f32 %v4968_v9 }
 0x2ff   :  { %2316 = vmax.xlane.f32.xlu0 %v2315_v19 }
 0x300   :  { %v1700_v21 = vpop.f32.mrb[14].mxu1  ;;  %vm1406_vm14 = vcmp.eq.f32.partialorder %v6139_v18, 0.0  ;;  %v5419_v18 = vld [vmem:[#allocation5 + $0x74] ss:$8 sps:$4 sm:$0xff]  }
 0x301   :  { %v6083_v24 = vsel %vm1398_vm7, -1e+09, %v1700_v21  ;;  %v5058_v25 = vpop.f32.mrb[15].mxu1 }
 0x302   :  { %v2318_v27 = vsel %vm2308_vm3, %v6083_v24, -inf }
 0x303   :  { %2319 = vmax.xlane.f32.xlu1 %v2318_v27 }
 0x304   :  { %v1774_v30 = vpop.f32.mrb[16].mxu1 }
 0x305   :  { %v6092_v32 = vsel %vm1399_vm8, -1e+09, %v1774_v30  ;;  %v5063_v33 = vpop.f32.mrb[17].mxu1 }
 0x306   :  { %v2321_v35 = vsel %vm2308_vm3, %v6092_v32, -inf }
 0x307   :  { %2322 = vmax.xlane.f32.xlu0 %v2321_v35 }
 0x308   :  { %v1848_v36 = vpop.f32.mrb[18].mxu1 }
 0x309   :  { %v6099_v37 = vsel %vm1400_vm9, -1e+09, %v1848_v36  ;;  %v5068_v38 = vpop.f32.mrb[19].mxu1 }
 0x30a   :  { %v2324_v39 = vsel %vm2308_vm3, %v6099_v37, -inf }
 0x30b   :  { %2325 = vmax.xlane.f32.xlu1 %v2324_v39 }
 0x319   :  { %v2311_v40 = vpop.xlane.xlu1 %2310 }
 0x31a   :  { %v2345_v41 = vsub.f32 %v2296_v60, %v2311_v40  ;;  %v4952_v60 = vunpack.c.3.s8 %v6027_v47 }
 0x31c   :  { %v2357_v42 = vmul.f32 1.442695, %v2345_v41  ;;  %v6112_v61 = vcvt.s32.f32 %v4952_v60 }
 0x31d   :  { %v2314_v43 = vpop.xlane.xlu0 %2313 }
 0x31e   :  { %5561 = vpow2.f32 %v2357_v42  ;;  %v2346_v44 = vsub.f32 %v2297_v0, %v2314_v43  ;;  %vm1401_vm10 = vcmp.eq.f32.partialorder %v6112_v61, 0.0  ;;  %v4967_v0 = vunpack.c.2.s8 %v6051_v4 }
 0x320   :  { %v2359_v45 = vmul.f32 1.442695, %v2346_v44  ;;  %v6127_v49 = vcvt.s32.f32 %v4967_v0 }
 0x322   :  { %5563 = vpow2.f32 %v2359_v45  ;;  %vm1404_vm12 = vcmp.eq.f32.partialorder %v6127_v49, 0.0 }
 0x328   :  { %v6103_v46 = vpop.eup %5561 }
 0x329   :  { %v2381_v48 = vsel %vm2308_vm3, %v6103_v46, 0.0 }
 0x32a   :  { %2382 = vadd.xlane.f32.xlu0 %v2381_v48 }
 0x32c   :  { %v6107_v56 = vpop.eup %5563 }
 0x32d   :  { %v2384_v59 = vsel %vm2308_vm3, %v6107_v56, 0.0 }
 0x32e   :  { %2385 = vadd.xlane.f32.xlu1 %v2384_v59 }
 0x33b   :  { %v1922_v3 = vpop.f32.mrb[20].mxu1 }
 0x33c   :  { %v6122_v5 = vsel %vm1401_vm10, -1e+09, %v1922_v3  ;;  %v5073_v7 = vpop.f32.mrb[21].mxu1 }
 0x33d   :  { %v2327_v47 = vsel %vm2308_vm3, %v6122_v5, -inf }
 0x33e   :  { %2328 = vmax.xlane.f32.xlu0 %v2327_v47 }
 0x33f   :  { %v1996_v54 = vpop.f32.mrb[22].mxu1 }
 0x340   :  { %v6134_v13 = vsel %vm1402_vm11, -1e+09, %v1996_v54  ;;  %v5078_v15 = vpop.f32.mrb[23].mxu1 }
 0x341   :  { %v2330_v16 = vsel %vm2308_vm3, %v6134_v13, -inf }
 0x342   :  { %2331 = vmax.xlane.f32.xlu1 %v2330_v16 }
 0x343   :  { %v2144_v4 = vpop.f32.mrb[24].mxu1 }
 0x344   :  { %v6144_v19 = vsel %vm1404_vm12, -1e+09, %v2144_v4  ;;  %v5088_v57 = vpop.f32.mrb[25].mxu1  ;;  %v2218_v21 = vpop.f32.mrb[14].mxu0 }
 0x345   :  { %v6148_v25 = vsel %vm1405_vm13, -1e+09, %v2218_v21  ;;  %v5093_v27 = vpop.f32.mrb[15].mxu0  ;;  %v2336_v30 = vsel %vm2308_vm3, %v6144_v19, -inf }
 0x346   :  { %2337 = vmax.xlane.f32.xlu1 %v2336_v30  ;;  %v2339_v33 = vsel %vm2308_vm3, %v6148_v25, -inf }
 0x347   :  { %v2292_v35 = vpop.f32.mrb[26].mxu1  ;;  %2340 = vmax.xlane.f32.xlu0 %v2339_v33 }
 0x348   :  { %v6157_v36 = vsel %vm1406_vm14, -1e+09, %v2292_v35  ;;  %v5098_v38 = vpop.f32.mrb[27].mxu1 }
 0x349   :  { %v2342_v39 = vsel %vm2308_vm3, %v6157_v36, -inf }
 0x34a   :  { %2343 = vmax.xlane.f32.xlu1 %v2342_v39 }
 0x359   :  { %v2335_v40 = vpop.xlane.xlu0 %2334 }
 0x35a   :  { %v2353_v41 = vsub.f32 %v6059_v8, %v2335_v40 }
 0x35b   :  { %1339 = vrot.lane.b32.xlu1 %v5955_v26, %s5768_s2 }
 0x35c   :  { %v2373_v42 = vmul.f32 1.442695, %v2353_v41 }
 0x35d   :  { %1337 = vrot.lane.b32.xlu0 %v5950_v22, %s5768_s2 }
 0x35e   :  { %5565 = vpow2.f32 %v2373_v42 }
 0x368   :  { %v6166_v43 = vpop.eup %5565 }
 0x369   :  { %v2405_v44 = vsel %vm2308_vm3, %v6166_v43, 0.0 }
 0x37f   :  { %2406 = vadd.xlane.f32.xlu1 %v2405_v44 }
 0x38c   :  { %v2317_v45 = vpop.xlane.xlu0 %2316 }
 0x38d   :  { %v2347_v48 = vsub.f32 %v6073_v17, %v2317_v45 }
 0x38f   :  { %v2361_v59 = vmul.f32 1.442695, %v2347_v48 }
 0x390   :  { %v2320_v60 = vpop.xlane.xlu1 %2319 }
 0x391   :  { %5567 = vpow2.f32 %v2361_v59  ;;  %v2348_v26 = vsub.f32 %v6083_v24, %v2320_v60 }
 0x393   :  { %v2363_v22 = vmul.f32 1.442695, %v2348_v26 }
 0x394   :  { %v2323_v62 = vpop.xlane.xlu0 %2322 }
 0x395   :  { %5569 = vpow2.f32 %v2363_v22  ;;  %v2349_v8 = vsub.f32 %v6092_v32, %v2323_v62 }
 0x397   :  { %v2365_v0 = vmul.f32 1.442695, %v2349_v8 }
 0x398   :  { %v2326_v2 = vpop.xlane.xlu1 %2325 }
 0x399   :  { %5571 = vpow2.f32 %v2365_v0  ;;  %v2350_v3 = vsub.f32 %v6099_v37, %v2326_v2 }
 0x39b   :  { %v6174_v7 = vpop.eup %5567  ;;  %v2367_v47 = vmul.f32 1.442695, %v2350_v3 }
 0x39c   :  { %v2387_v17 = vsel %vm2308_vm3, %v6174_v7, 0.0 }
 0x39d   :  { %5573 = vpow2.f32 %v2367_v47  ;;  %2388 = vadd.xlane.f32.xlu0 %v2387_v17 }
 0x39f   :  { %v6178_v9 = vpop.eup %5569 }
 0x3a0   :  { %v2390_v24 = vsel %vm2308_vm3, %v6178_v9, 0.0 }
 0x3a1   :  { %2391 = vadd.xlane.f32.xlu1 %v2390_v24 }
 0x3a3   :  { %v6182_v32 = vpop.eup %5571 }
 0x3a4   :  { %v2393_v54 = vsel %vm2308_vm3, %v6182_v32, 0.0 }
 0x3a5   :  { %2394 = vadd.xlane.f32.xlu0 %v2393_v54 }
 0x3a7   :  { %v6186_v37 = vpop.eup %5573 }
 0x3a8   :  { %v2396_v15 = vsel %vm2308_vm3, %v6186_v37, 0.0 }
 0x3a9   :  { %2397 = vadd.xlane.f32.xlu1 %v2396_v15 }
 0x3b7   :  { %v2383_v16 = vpop.xlane.xlu0 %2382 }
 0x3b8   :  { %5575 = vrcp.f32 %v2383_v16 }
 0x3bb   :  { %v2386_v4 = vpop.xlane.xlu1 %2385 }
 0x3bc   :  { %5577 = vrcp.f32 %v2386_v4 }
 0x3c2   :  { %v5576_v57 = vpop.eup %5575 }
 0x3c3   :  { %v2429_v21 = vmul.f32 %v5576_v57, %v6103_v46 }
 0x3c5   :  { %v2441_v27 = vsel %vm1395_vm2, 0.0, %v2429_v21 }
 0x3c6   :  { %v5578_v30 = vpop.eup %5577  ;;  %5102 = vmatmul.mubr.msk.f32.vlgmr.msra.gmra.mrb[16].mxu0 %vm2308_vm3, %v2441_v27 }
 0x3c7   :  { %v2430_v33 = vmul.f32 %v5578_v30, %v6107_v56  ;;  %5111 = vmatprep.mubr.msk.f32.mxu0 %vm5767_vm0, %v5766_v11 }
 0x3c9   :  { %v2442_v35 = vsel %vm1396_vm4, 0.0, %v2430_v33 }
 0x3ca   :  { %5107 = vmatmul.mubr.msk.f32.vlgmr.msra.gmra.mrb[28].mxu1 %vm2308_vm3, %v2442_v35 }
 0x3cb   :  { %v2329_v38 = vpop.xlane.xlu0 %2328  ;;  %5116 = vmatprep.mubr.msk.f32.mxu1 %vm5767_vm0, %v5766_v11 }
 0x3cc   :  { %v2351_v55 = vsub.f32 %v6122_v5, %v2329_v38 }
 0x3ce   :  { %v2369_v46 = vmul.f32 1.442695, %v2351_v55 }
 0x3cf   :  { %v2332_v39 = vpop.xlane.xlu1 %2331 }
 0x3d0   :  { %5579 = vpow2.f32 %v2369_v46  ;;  %v2352_v40 = vsub.f32 %v6134_v13, %v2332_v39 }
 0x3d2   :  { %v2371_v56 = vmul.f32 1.442695, %v2352_v40 }
 0x3d3   :  { %v2338_v41 = vpop.xlane.xlu1 %2337 }
 0x3d4   :  { %5581 = vpow2.f32 %v2371_v56  ;;  %v2341_v42 = vpop.xlane.xlu0 %2340  ;;  %v2354_v26 = vsub.f32 %v6144_v19, %v2338_v41 }
 0x3d5   :  { %v2355_v60 = vsub.f32 %v6148_v25, %v2341_v42 }
 0x3d6   :  { %v2375_v8 = vmul.f32 1.442695, %v2354_v26 }
 0x3d7   :  { %v2344_v44 = vpop.xlane.xlu1 %2343  ;;  %v2377_v22 = vmul.f32 1.442695, %v2355_v60  ;;  %v5398_v60 = vld [vmem:[#allocation5 + $0x14] ss:$8 sps:$4 sm:$0xff]  }
 0x3d8   :  { %v1338_v58 = vpop.permute.xlu0 %1337  ;;  %v2356_v62 = vsub.f32 %v6157_v36, %v2344_v44 }
 0x3d9   :  { %5110 = vmatpush3.msra.mxu0 %v1338_v58  ;;  %5583 = vpow2.f32 %v2377_v22 }
 0x3da   :  { %v6204_v45 = vpop.eup %5579  ;;  %5119 = vmatprep.subr.mxu0 %v5766_v11  ;;  %v2379_v0 = vmul.f32 1.442695, %v2356_v62  ;;  %5585 = vpow2.f32 %v2375_v8  ;;  %v5396_v8 = vld [vmem:[#allocation5 + $0x10] ss:$8 sps:$4 sm:$0xff]  }
 0x3db   :  { %v1340_v48 = vpop.permute.xlu1 %1339  ;;  %v2399_v5 = vsel %vm2308_vm3, %v6204_v45, 0.0 }
 0x3dc   :  { %5115 = vmatpush3.msra.mxu1 %v1340_v48  ;;  %2400 = vadd.xlane.f32.xlu0 %v2399_v5  ;;  %5587 = vpow2.f32 %v2379_v0 }
 0x3dd   :  { %5124 = vmatprep.subr.mxu1 %v5766_v11 }
 0x3de   :  { %v6210_v13 = vpop.eup %5581 }
 0x3df   :  { %v2402_v59 = vsel %vm2308_vm3, %v6210_v13, 0.0 }
 0x3e0   :  { %2403 = vadd.xlane.f32.xlu1 %v2402_v59 }
 0x3e3   :  { %v6221_v2 = vpop.eup %5583 }
 0x3e4   :  { %v6223_v3 = vpop.eup %5585  ;;  %v2411_v47 = vsel %vm2308_vm3, %v6221_v2, 0.0 }
 0x3e5   :  { %v2408_v25 = vsel %vm2308_vm3, %v6223_v3, 0.0 }
 0x3e6   :  { %v6227_v17 = vpop.eup %5587 }
 0x3e7   :  { %v2414_v19 = vsel %vm2308_vm3, %v6227_v17, 0.0 }
 0x3f1   :  { %1347 = vrot.lane.b32.xlu1 %v5958_v28, %s5768_s2 }
 0x3f2   :  { %1345 = vrot.lane.b32.xlu0 %v5952_v23, %s5768_s2 }
 0x40c   :  { %v2407_v36 = vpop.xlane.xlu1 %2406 }
 0x411   :  { %2412 = vadd.xlane.f32.xlu0 %v2411_v47  ;;  %v5401_v47 = vld [vmem:[#allocation5 + $0x24] ss:$8 sps:$4 sm:$0xff]  }
 0x415   :  { %2415 = vadd.xlane.f32.xlu1 %v2414_v19  ;;  %2409 = vadd.xlane.f32.xlu0 %v2408_v25  ;;  %v5407_v19 = vld [vmem:[#allocation5 + $0x44] ss:$8 sps:$4 sm:$0xff]  }
 0x426   :  { %1353 = vrot.lane.b32.xlu1 %v5970_v31, %s5768_s2 }
 0x42a   :  { %v2389_v24 = vpop.xlane.xlu0 %2388 }
 0x42b   :  { %5589 = vrcp.f32 %v2389_v24  ;;  %1355 = vrot.lane.b32.xlu0 %v5972_v34, %s5768_s2  ;;  %v5404_v24 = vld [vmem:[#allocation5 + $0x34] ss:$8 sps:$4 sm:$0xff]  }
 0x42e   :  { %v2392_v54 = vpop.xlane.xlu1 %2391 }
 0x42f   :  { %5591 = vrcp.f32 %v2392_v54  ;;  %v5405_v54 = vld [vmem:[#allocation5 + $0x40] ss:$8 sps:$4 sm:$0xff]  }
 0x432   :  { %v2395_v15 = vpop.xlane.xlu0 %2394 }
 0x433   :  { %5593 = vrcp.f32 %v2395_v15  ;;  %v5408_v15 = vld [vmem:[#allocation5 + $0x50] ss:$8 sps:$4 sm:$0xff]  }
 0x435   :  { %v5590_v16 = vpop.eup %5589 }
 0x436   :  { %v2398_v4 = vpop.xlane.xlu1 %2397  ;;  %v2431_v57 = vmul.f32 %v5590_v16, %v6174_v7  ;;  %v5416_v16 = vld [vmem:[#allocation5 + $0x84] ss:$8 sps:$4 sm:$0xff]  }
 0x437   :  { %5595 = vrcp.f32 %v2398_v4  ;;  %v5413_v4 = vld [vmem:[#allocation5 + $0x64] ss:$8 sps:$4 sm:$0xff]  }
 0x438   :  { %v2443_v21 = vsel %vm1397_vm6, 0.0, %v2431_v57  ;;  %5597 = vrcp.f32 %v2407_v36  ;;  %v5399_v36 = vld [vmem:[#allocation5 + $0x20] ss:$8 sps:$4 sm:$0xff]  }
 0x439   :  { %v5592_v27 = vpop.eup %5591  ;;  %5112 = vmatmul.mubr.msk.f32.vlgmr.msra.gmra.mrb[18].mxu0 %vm2308_vm3, %v2443_v21  ;;  %v5411_v57 = vld [vmem:[#allocation5 + $0x60] ss:$8 sps:$4 sm:$0xff]   ;;  %v5422_v21 = vld [vmem:[#allocation5 + $0x94] ss:$8 sps:$4 sm:$0xff]  }
 0x43a   :  { %5120 = vmatpush3.msra.mxu0 %v5952_v23  ;;  %v2432_v30 = vmul.f32 %v5592_v27, %v6178_v9  ;;  %5121 = vmatprep.mubr.msk.f32.mxu0 %vm5767_vm0, %v5766_v11  ;;  %v5420_v27 = vld [vmem:[#allocation5 + $0x90] ss:$8 sps:$4 sm:$0xff]  }
 0x43b   :  { %5129 = vmatprep.subr.mxu0 %v5766_v11 }
 0x43c   :  { %v2444_v33 = vsel %vm1398_vm7, 0.0, %v2432_v30  ;;  %v5417_v30 = vld [vmem:[#allocation5 + $0x70] ss:$8 sps:$4 sm:$0xff]  }
 0x43d   :  { %v5594_v7 = vpop.eup %5593  ;;  %5117 = vmatmul.mubr.msk.f32.vlgmr.msra.gmra.mrb[30].mxu1 %vm2308_vm3, %v2444_v33  ;;  %v5425_v33 = vld [vmem:[#allocation5 + $0xa4] ss:$8 sps:$4 sm:$0xff]  }
 0x43e   :  { %5125 = vmatpush3.msra.mxu1 %v5958_v28  ;;  %v2433_v12 = vmul.f32 %v5594_v7, %v6182_v32  ;;  %5126 = vmatprep.mubr.msk.f32.mxu1 %vm5767_vm0, %v5766_v11  ;;  %v5431_v7 = vld [vmem:[#allocation5 + $0xc4] ss:$8 sps:$4 sm:$0xff]  }
 0x43f   :  { %5134 = vmatprep.subr.mxu1 %v5766_v11 }
 0x440   :  { %v2445_v23 = vsel %vm1399_vm8, 0.0, %v2433_v12  ;;  %v5423_v12 = vld [vmem:[#allocation5 + $0xa0] ss:$8 sps:$4 sm:$0xff]  }
 0x441   :  { %v5596_v9 = vpop.eup %5595  ;;  %5122 = vmatmul.mubr.msk.f32.vlgmr.msra.gmra.mrb[20].mxu0 %vm2308_vm3, %v2445_v23  ;;  %v5428_v23 = vld [vmem:[#allocation5 + $0xb4] ss:$8 sps:$4 sm:$0xff]  }
 0x442   :  { %v2434_v14 = vmul.f32 %v5596_v9, %v6186_v37  ;;  %5131 = vmatprep.mubr.msk.f32.mxu0 %vm5767_vm0, %v5766_v11  ;;  %v5598_v38 = vpop.eup %5597  ;;  %v5426_v9 = vld [vmem:[#allocation5 + $0xb0] ss:$8 sps:$4 sm:$0xff]  }
 0x443   :  { %v2437_v39 = vmul.f32 %v5598_v38, %v6166_v43 }
 0x444   :  { %v2446_v28 = vsel %vm1400_vm9, 0.0, %v2434_v14  ;;  %v5443_v14 = vld [vmem:[#allocation5 + $0x104] ss:$8 sps:$4 sm:$0xff]  }
 0x445   :  { %5127 = vmatmul.mubr.msk.f32.vlgmr.msra.gmra.mrb[32].mxu1 %vm2308_vm3, %v2446_v28  ;;  %v2449_v61 = vsel %vm1403_vm5, 0.0, %v2437_v39 }
 0x446   :  { %5136 = vmatprep.mubr.msk.f32.mxu1 %vm5767_vm0, %v5766_v11 }
 0x469   :  { %v2401_v32 = vpop.xlane.xlu0 %2400 }
 0x46a   :  { %5599 = vrcp.f32 %v2401_v32 }
 0x46d   :  { %v2404_v20 = vpop.xlane.xlu1 %2403  ;;  %v1346_v35 = vpop.permute.xlu0 %1345 }
 0x46e   :  { %5601 = vrcp.f32 %v2404_v20  ;;  %5130 = vmatpush3.msra.mxu0 %v1346_v35  ;;  %v5429_v35 = vld [vmem:[#allocation5 + $0xc0] ss:$8 sps:$4 sm:$0xff]  }
 0x46f   :  { %5139 = vmatprep.subr.mxu0 %v5766_v11 }
 0x471   :  { %v1348_v37 = vpop.permute.xlu1 %1347 }
 0x472   :  { %5135 = vmatpush3.msra.mxu1 %v1348_v37 }
 0x473   :  { %5144 = vmatprep.subr.mxu1 %v5766_v11 }
 0x474   :  { %v5600_v29 = vpop.eup %5599 }
 0x475   :  { %v2435_v55 = vmul.f32 %v5600_v29, %v6204_v45  ;;  %v5434_v29 = vld [vmem:[#allocation5 + $0xd4] ss:$8 sps:$4 sm:$0xff]  }
 0x477   :  { %v2447_v46 = vsel %vm1401_vm10, 0.0, %v2435_v55 }
 0x478   :  { %v5602_v40 = vpop.eup %5601  ;;  %5132 = vmatmul.mubr.msk.f32.vlgmr.msra.gmra.mrb[22].mxu0 %vm2308_vm3, %v2447_v46  ;;  %v5432_v46 = vld [vmem:[#allocation5 + $0xd0] ss:$8 sps:$4 sm:$0xff]  }
 0x479   :  { %5140 = vmatpush3.msra.mxu0 %v5970_v31  ;;  %5141 = vmatprep.mubr.msk.f32.mxu0 %vm5767_vm0, %v5766_v11  ;;  %v2436_v56 = vmul.f32 %v5602_v40, %v6210_v13  ;;  %v5393_v13 = vld [vmem:[#allocation5] ss:$8 sps:$4 sm:$0xff]   ;;  %v5437_v40 = vld [vmem:[#allocation5 + $0xe4] ss:$8 sps:$4 sm:$0xff]  }
 0x47a   :  { %5149 = vmatprep.subr.mxu0 %v5766_v11 }
 0x47b   :  { %v2448_v41 = vsel %vm1402_vm11, 0.0, %v2436_v56 }
 0x47c   :  { %5137 = vmatmul.mubr.msk.f32.vlgmr.msra.gmra.mrb[34].mxu1 %vm2308_vm3, %v2448_v41  ;;  %5142 = vmatmul.mubr.msk.f32.vlgmr.msra.gmra.mrb[24].mxu0 %vm2308_vm3, %v2449_v61  ;;  %v5435_v41 = vld [vmem:[#allocation5 + $0xe0] ss:$8 sps:$4 sm:$0xff]  }
 0x47d   :  { %5145 = vmatpush3.msra.mxu1 %v5972_v34  ;;  %5151 = vmatprep.mubr.msk.f32.mxu0 %vm5767_vm0, %v5766_v11  ;;  %v5395_v34 = vld [vmem:[#allocation5 + $0x4] ss:$8 sps:$4 sm:$0xff]   ;;  %v5441_v61 = vld [vmem:[#allocation5 + $0x100] ss:$8 sps:$4 sm:$0xff]  }
 0x47e   :  { %5146 = vmatprep.mubr.msk.f32.mxu1 %vm5767_vm0, %v5766_v11  ;;  %5154 = vmatprep.subr.mxu1 %v5766_v11 }
 0x499   :  { %v6289_v31 = vpop.f32.mrb[16].mxu0 }
 0x49a   :  { %v5103_v63 = vpop.f32.mrb[17].mxu0 }
 0x49d   :  { %v2595_v43 = vpop.f32.mrb[28].mxu1 }
 0x49e   :  { %v3329_v6 = vpack.c.bf16 %v2595_v43, %v6289_v31  ;;  %v2413_v42 = vpop.xlane.xlu0 %2412  ;;  %v5108_v44 = vpop.f32.mrb[29].mxu1  ;;  %v5440_v43 = vld [vmem:[#allocation5 + $0xf4] ss:$8 sps:$4 sm:$0xff]  }
 0x49f   :  { %5603 = vrcp.f32 %v2413_v42  ;;  %v5438_v42 = vld [vmem:[#allocation5 + $0xf0] ss:$8 sps:$4 sm:$0xff]  }
 0x4a0   :  { %v5444_v44 = vld [vmem:[#allocation5 + $0x110] ss:$8 sps:$4 sm:$0xff]  }
 0x4a2   :  { %v2416_v58 = vpop.xlane.xlu1 %2415  ;;  %v2410_v45 = vpop.xlane.xlu0 %2409 }
 0x4a3   :  { %5605 = vrcp.f32 %v2416_v58  ;;  %v5449_v58 = vld [vmem:[#allocation5 + $0x144] ss:$8 sps:$4 sm:$0xff]  }
 0x4a4   :  { %5607 = vrcp.f32 %v2410_v45  ;;  %v5452_v45 = vld [vmem:[#allocation5 + $0x124] ss:$8 sps:$4 sm:$0xff]  }
 0x4a6   :  { %v1354_v48 = vpop.permute.xlu1 %1353  ;;  %v1356_v10 = vpop.permute.xlu0 %1355 }
 0x4a7   :  { %5150 = vmatpush3.msra.mxu0 %v1354_v48  ;;  %v5458_v48 = vld [vmem:[#allocation5 + $0x134] ss:$8 sps:$4 sm:$0xff]  }
 0x4a8   :  { %3426 = vmatprep.subr.bf16.mxu0 %v5395_v34  ;;  %v5450_v34 = vld [vmem:[#allocation5 + $0x120] ss:$8 sps:$4 sm:$0xff]  }
 0x4a9   :  { %v5604_v5 = vpop.eup %5603 }
 0x4aa   :  { %v2439_v59 = vmul.f32 %v5604_v5, %v6221_v2  ;;  %v5456_v5 = vld [vmem:[#allocation5 + $0x130] ss:$8 sps:$4 sm:$0xff]  }
 0x4ac   :  { %v2451_v26 = vsel %vm1405_vm13, 0.0, %v2439_v59 }
 0x4ad   :  { %v5606_v22 = vpop.eup %5605  ;;  %5152 = vmatmul.mubr.msk.f32.vlgmr.msra.gmra.mrb[26].mxu0 %vm2308_vm3, %v2451_v26 }
 0x4ae   :  { %v5608_v62 = vpop.eup %5607  ;;  %3427 = vmatpush1.bf16.msra.mxu0 %v5393_v13  ;;  %3458 = vmatprep.mubr.bf16.mxu0 %v5764_v1  ;;  %v2440_v25 = vmul.f32 %v5606_v22, %v6227_v17  ;;  %v5402_v17 = vld [vmem:[#allocation5 + $0x30] ss:$8 sps:$4 sm:$0xff]   ;;  %v5447_v22 = vld [vmem:[#allocation5 + $0x140] ss:$8 sps:$4 sm:$0xff]  }
 0x4af   :  { %3428 = vmatprep.subr.bf16.mxu0 %v5398_v60  ;;  %v2438_v0 = vmul.f32 %v5608_v62, %v6223_v3  ;;  %v5410_v3 = vld [vmem:[#allocation5 + $0x54] ss:$8 sps:$4 sm:$0xff]  }
 0x4b0   :  { %v2452_v49 = vsel %vm1406_vm14, 0.0, %v2440_v25  ;;  %v5459_v25 = vld [vmem:[#allocation5 + $0x160] ss:$8 sps:$4 sm:$0xff]  }
 0x4b1   :  { %v2450_v2 = vsel %vm1404_vm12, 0.0, %v2438_v0 }
 0x4b2   :  { %5147 = vmatmul.mubr.msk.f32.vlgmr.msra.gmra.mrb[36].mxu1 %vm2308_vm3, %v2450_v2  ;;  %3429 = vmatpush1.bf16.msra.mxu0 %v5396_v8  ;;  %v5461_v2 = vld [vmem:[#allocation5 + $0x164] ss:$8 sps:$4 sm:$0xff]  }
 0x4b3   :  { %5155 = vmatpush3.msra.mxu1 %v1356_v10  ;;  %5156 = vmatprep.mubr.msk.f32.mxu1 %vm5767_vm0, %v5766_v11  ;;  %v5414_v11 = vld [vmem:[#allocation5 + $0x80] ss:$8 sps:$4 sm:$0xff]   ;;  %v5464_v10 = vld [vmem:[#allocation5 + $0x174] ss:$8 sps:$4 sm:$0xff]  }
 0x4b4   :  { %3430 = vmatprep.subr.bf16.mxu0 %v5401_v47  ;;  %3512 = vmatprep.subr.bf16.mxu1 %v5407_v19  ;;  %v5455_v47 = vld [vmem:[#allocation5 + $0x154] ss:$8 sps:$4 sm:$0xff]   ;;  %v5453_v19 = vld [vmem:[#allocation5 + $0x150] ss:$8 sps:$4 sm:$0xff]  }
 0x4b6   :  { %5157 = vmatmul.mubr.msk.f32.vlgmr.msra.gmra.mrb[38].mxu1 %vm2308_vm3, %v2452_v49  ;;  %3431 = vmatpush1.bf16.msra.mxu0 %v5399_v36  ;;  %v5462_v36 = vld [vmem:[#allocation5 + $0x170] ss:$8 sps:$4 sm:$0xff]  }
 0x4b7   :  { %3432 = vmatprep.subr.bf16.mxu0 %v5404_v24  ;;  %3513 = vmatpush1.bf16.msra.mxu1 %v5405_v54 }
 0x4b8   :  { %3514 = vmatprep.subr.bf16.mxu1 %v5410_v3  ;;  %3544 = vmatprep.mubr.bf16.mxu1 %v5764_v1 }
 0x4ba   :  { %3433 = vmatpush1.bf16.msra.mxu0 %v5402_v17 }
 0x4bb   :  { %3515 = vmatpush1.bf16.msra.mxu1 %v5408_v15  ;;  %3598 = vmatprep.subr.bf16.mxu0 %v5416_v16 }
 0x4bc   :  { %3516 = vmatprep.subr.bf16.mxu1 %v5413_v4 }
 0x4bd   :  { %4835 = vmatmul.mubr.msk.bf16.vlgmr.msra.gmra.mrb[28].mxu0 %vm1407_vm1, %v3329_v6  ;;  %v5446_v6 = vld [vmem:[#allocation5 + $0x114] ss:$8 sps:$4 sm:$0xff]  }
 0x4be   :  { %3599 = vmatpush1.bf16.msra.mxu0 %v5414_v11  ;;  %3630 = vmatprep.mubr.bf16.mxu0 %v5764_v1 }
 0x4bf   :  { %3517 = vmatpush1.bf16.msra.mxu1 %v5411_v57  ;;  %3600 = vmatprep.subr.bf16.mxu0 %v5422_v21 }
 0x4c0   :  { %3518 = vmatprep.subr.bf16.mxu1 %v5419_v18 }
 0x4c2   :  { %3601 = vmatpush1.bf16.msra.mxu0 %v5420_v27 }
 0x4c3   :  { %3519 = vmatpush1.bf16.msra.mxu1 %v5417_v30  ;;  %3602 = vmatprep.subr.bf16.mxu0 %v5425_v33 }
 0x4c4   :  { %3684 = vmatprep.subr.bf16.mxu1 %v5431_v7 }
 0x4c6   :  { %3603 = vmatpush1.bf16.msra.mxu0 %v5423_v12 }
 0x4c7   :  { %3604 = vmatprep.subr.bf16.mxu0 %v5428_v23 }
 0x4ca   :  { %3605 = vmatpush1.bf16.msra.mxu0 %v5426_v9 }
 0x4cb   :  { %3770 = vmatprep.subr.bf16.mxu0 %v5443_v14 }
 0x50c   :  { %v2668_v28 = vpop.f32.mrb[18].mxu0 }
 0x50d   :  { %v5113_v32 = vpop.f32.mrb[19].mxu0 }
 0x510   :  { %v2741_v20 = vpop.f32.mrb[30].mxu1 }
 0x511   :  { %v3330_v37 = vpack.c.bf16 %v2741_v20, %v2668_v28  ;;  %v5118_v38 = vpop.f32.mrb[31].mxu1 }
 0x513   :  { %4844 = vmatmul.mubr.msk.bf16.vlgmr.msra.gmra.mrb[40].mxu1 %vm1407_vm1, %v3330_v37 }
 0x514   :  { %v2814_v55 = vpop.f32.mrb[20].mxu0  ;;  %3685 = vmatpush1.bf16.msra.mxu1 %v5429_v35  ;;  %3716 = vmatprep.mubr.bf16.mxu1 %v5764_v1 }
 0x515   :  { %v5123_v39 = vpop.f32.mrb[21].mxu0  ;;  %3686 = vmatprep.subr.bf16.mxu1 %v5434_v29 }
 0x518   :  { %v2887_v56 = vpop.f32.mrb[32].mxu1  ;;  %3687 = vmatpush1.bf16.msra.mxu1 %v5432_v46 }
 0x519   :  { %v3331_v31 = vpack.c.bf16 %v2887_v56, %v2814_v55  ;;  %v5128_v63 = vpop.f32.mrb[33].mxu1  ;;  %3688 = vmatprep.subr.bf16.mxu1 %v5437_v40 }
 0x51b   :  { %4853 = vmatmul.mubr.msk.bf16.vlgmr.msra.gmra.mrb[32].mxu0 %vm1407_vm1, %v3331_v31 }
 0x51c   :  { %3689 = vmatpush1.bf16.msra.mxu1 %v5435_v41  ;;  %3771 = vmatpush1.bf16.msra.mxu0 %v5441_v61 }
 0x51d   :  { %3690 = vmatprep.subr.bf16.mxu1 %v5440_v43  ;;  %3772 = vmatprep.subr.bf16.mxu0 %v5446_v6 }
 0x51e   :  { %3802 = vmatprep.mubr.bf16.mxu0 %v5764_v1 }
 0x520   :  { %3691 = vmatpush1.bf16.msra.mxu1 %v5438_v42  ;;  %3773 = vmatpush1.bf16.msra.mxu0 %v5444_v44 }
 0x521   :  { %3856 = vmatprep.subr.bf16.mxu1 %v5449_v58  ;;  %3774 = vmatprep.subr.bf16.mxu0 %v5452_v45 }
 0x524   :  { %3775 = vmatpush1.bf16.msra.mxu0 %v5450_v34 }
 0x525   :  { %3776 = vmatprep.subr.bf16.mxu0 %v5458_v48 }
 0x528   :  { %3777 = vmatpush1.bf16.msra.mxu0 %v5456_v5 }
 0x54b   :  { %v2960_v13 = vpop.f32.mrb[22].mxu0 }
 0x54c   :  { %v5133_v59 = vpop.f32.mrb[23].mxu0 }
 0x54f   :  { %v3033_v60 = vpop.f32.mrb[34].mxu1  ;;  %v3106_v26 = vpop.f32.mrb[24].mxu0 }
 0x550   :  { %v3332_v62 = vpack.c.bf16 %v3033_v60, %v2960_v13  ;;  %v5138_v8 = vpop.f32.mrb[35].mxu1  ;;  %v5143_v0 = vpop.f32.mrb[25].mxu0 }
 0x552   :  { %4862 = vmatmul.mubr.msk.bf16.vlgmr.msra.gmra.mrb[44].mxu1 %vm1407_vm1, %v3332_v62 }
 0x553   :  { %3857 = vmatpush1.bf16.msra.mxu1 %v5447_v22  ;;  %3888 = vmatprep.mubr.bf16.mxu1 %v5764_v1 }
 0x554   :  { %3858 = vmatprep.subr.bf16.mxu1 %v5455_v47 }
 0x557   :  { %3859 = vmatpush1.bf16.msra.mxu1 %v5453_v19 }
 0x558   :  { %3860 = vmatprep.subr.bf16.mxu1 %v5461_v2 }
 0x55b   :  { %3861 = vmatpush1.bf16.msra.mxu1 %v5459_v25 }
 0x55c   :  { %3862 = vmatprep.subr.bf16.mxu1 %v5464_v10 }
 0x55f   :  { %3863 = vmatpush1.bf16.msra.mxu1 %v5462_v36 }
 0x580   :  { %v3252_v24 = vpop.f32.mrb[26].mxu0 }
 0x581   :  { %v5153_v54 = vpop.f32.mrb[27].mxu0 }
 0x585   :  { %v3179_v3 = vpop.f32.mrb[36].mxu1 }
 0x586   :  { %v3333_v49 = vpack.c.bf16 %v3179_v3, %v3106_v26  ;;  %v5148_v17 = vpop.f32.mrb[37].mxu1 }
 0x588   :  { %4871 = vmatmul.mubr.msk.bf16.vlgmr.msra.gmra.mrb[36].mxu0 %vm1407_vm1, %v3333_v49 }
 0x589   :  { %v3325_v15 = vpop.f32.mrb[38].mxu1 }
 0x58a   :  { %v3334_v16 = vpack.c.bf16 %v3325_v15, %v3252_v24  ;;  %v5158_v1 = vpop.f32.mrb[39].mxu1 }
 0x58c   :  { %4880 = vmatmul.mubr.msk.bf16.vlgmr.msra.gmra.mrb[48].mxu1 %vm1407_vm1, %v3334_v16 }
 0x590   :  { %v3460_v4 = vpop.f32.mrb[28].mxu0 }
 0x591   :  { %v3461_v11 = vadd.f32 %v3460_v4, %v5904_v52  ;;  %v3462_v57 = vpop.f32.mrb[29].mxu0 }
 0x592   :  { %v3463_v21 = vadd.f32 %v3462_v57, %v5906_v53  ;;  %v3464_v18 = vpop.f32.mrb[30].mxu0 }
 0x593   :  { %v3465_v27 = vadd.f32 %v3464_v18, %v5900_v50  ;;  %v3466_v30 = vpop.f32.mrb[31].mxu0 }
 0x594   :  { %v3467_v33 = vadd.f32 %v3466_v30, %v5902_v51  ;;  %v3899_v7 = vadd.f32 %v3463_v21, %v3461_v11 }
 0x596   :  { %3900 = vadd.xlane.f32.xlu1 %v3899_v7  ;;  %v3902_v12 = vadd.f32 %v3467_v33, %v3465_v27 }
 0x598   :  { %3903 = vadd.xlane.f32.xlu0 %v3902_v12 }
 0x5e6   :  { %v3546_v23 = vpop.f32.mrb[40].mxu1 }
 0x5e7   :  { %v6323_v9 = vadd.f32 %v3546_v23, %v5904_v52  ;;  %v3548_v14 = vpop.f32.mrb[41].mxu1 }
 0x5e8   :  { %v6326_v28 = vadd.f32 %v3548_v14, %v5906_v53  ;;  %v3550_v32 = vpop.f32.mrb[42].mxu1 }
 0x5e9   :  { %v6329_v20 = vadd.f32 %v3550_v32, %v5900_v50  ;;  %v3552_v35 = vpop.f32.mrb[43].mxu1 }
 0x5ea   :  { %v6332_v37 = vadd.f32 %v3552_v35, %v5902_v51  ;;  %v3905_v38 = vadd.f32 %v6326_v28, %v6323_v9 }
 0x5ec   :  { %3906 = vadd.xlane.f32.xlu0 %v3905_v38  ;;  %v3908_v29 = vadd.f32 %v6332_v37, %v6329_v20 }
 0x5ee   :  { %v3632_v55 = vpop.f32.mrb[32].mxu0  ;;  %3909 = vadd.xlane.f32.xlu1 %v3908_v29 }
 0x5ef   :  { %v6339_v46 = vadd.f32 %v3632_v55, %v5904_v52  ;;  %v3634_v39 = vpop.f32.mrb[33].mxu0 }
 0x5f0   :  { %v6342_v40 = vadd.f32 %v3634_v39, %v5906_v53  ;;  %v3636_v56 = vpop.f32.mrb[34].mxu0 }
 0x5f1   :  { %v6345_v41 = vadd.f32 %v3636_v56, %v5900_v50  ;;  %v3638_v61 = vpop.f32.mrb[35].mxu0 }
 0x5f2   :  { %v6348_v31 = vadd.f32 %v3638_v61, %v5902_v51  ;;  %v3911_v63 = vadd.f32 %v6342_v40, %v6339_v46 }
 0x5f4   :  { %3912 = vadd.xlane.f32.xlu0 %v3911_v63  ;;  %v3914_v43 = vadd.f32 %v6348_v31, %v6345_v41 }
 0x5f6   :  { %3915 = vadd.xlane.f32.xlu1 %v3914_v43 }
 0x623   :  { %v3901_v60 = vpop.xlane.xlu1 %3900 }
 0x624   :  { %v3936_v22 = vmul.f32 0.00390625, %v3901_v60 }
 0x625   :  { %v3718_v6 = vpop.f32.mrb[44].mxu1  ;;  %v3904_v26 = vpop.xlane.xlu0 %3903 }
 0x626   :  { %v6355_v42 = vadd.f32 %v3718_v6, %v5904_v52  ;;  %v3720_v44 = vpop.f32.mrb[45].mxu1  ;;  %v3937_v47 = vmul.f32 0.00390625, %v3904_v26  ;;  %v6379_v36 = vsub.f32 %v3461_v11, %v3936_v22  ;;  %v6381_v24 = vsub.f32 %v3463_v21, %v3936_v22 }
 0x627   :  { %v6358_v58 = vadd.f32 %v3720_v44, %v5906_v53  ;;  %v3722_v45 = vpop.f32.mrb[46].mxu1 }
 0x628   :  { %v6361_v34 = vadd.f32 %v3722_v45, %v5900_v50  ;;  %v3724_v48 = vpop.f32.mrb[47].mxu1  ;;  %v6391_v16 = vsub.f32 %v3465_v27, %v3937_v47  ;;  %v6393_v1 = vsub.f32 %v3467_v33, %v3937_v47  ;;  %v3973_v30 = vmul.f32 %v6381_v24, %v6381_v24 }
 0x629   :  { %v6364_v5 = vadd.f32 %v3724_v48, %v5902_v51  ;;  %v3917_v13 = vadd.f32 %v6358_v58, %v6355_v42 }
 0x62b   :  { %3918 = vadd.xlane.f32.xlu0 %v3917_v13  ;;  %v3920_v59 = vadd.f32 %v6364_v5, %v6361_v34 }
 0x62d   :  { %3921 = vadd.xlane.f32.xlu1 %v3920_v59 }
 0x65b   :  { %v3804_v62 = vpop.f32.mrb[36].mxu0 }
 0x65c   :  { %v6371_v8 = vadd.f32 %v3804_v62, %v5904_v52  ;;  %v3806_v0 = vpop.f32.mrb[37].mxu0 }
 0x65d   :  { %v6374_v19 = vadd.f32 %v3806_v0, %v5906_v53  ;;  %v3808_v2 = vpop.f32.mrb[38].mxu0 }
 0x65e   :  { %v6377_v25 = vadd.f32 %v3808_v2, %v5900_v50  ;;  %v3810_v10 = vpop.f32.mrb[39].mxu0 }
 0x65f   :  { %v6384_v54 = vadd.f32 %v3810_v10, %v5902_v51  ;;  %v3890_v3 = vpop.f32.mrb[48].mxu1  ;;  %v3923_v49 = vadd.f32 %v6374_v19, %v6371_v8 }
 0x660   :  { %v6389_v17 = vadd.f32 %v3890_v3, %v5904_v52  ;;  %v3892_v15 = vpop.f32.mrb[49].mxu1 }
 0x661   :  { %v6396_v4 = vadd.f32 %v3892_v15, %v5906_v53  ;;  %v3894_v11 = vpop.f32.mrb[50].mxu1  ;;  %3924 = vadd.xlane.f32.xlu0 %v3923_v49  ;;  %v3926_v57 = vadd.f32 %v6384_v54, %v6377_v25  ;;  %v3972_v53 = vmul.f32 %v6379_v36, %v6379_v36 }
 0x662   :  { %v6401_v21 = vadd.f32 %v3894_v11, %v5900_v50  ;;  %v3896_v18 = vpop.f32.mrb[51].mxu1  ;;  %v3974_v50 = vmul.f32 %v6391_v16, %v6391_v16 }
 0x663   :  { %v6404_v52 = vadd.f32 %v3896_v18, %v5902_v51  ;;  %3927 = vadd.xlane.f32.xlu1 %v3926_v57  ;;  %v3929_v27 = vadd.f32 %v6396_v4, %v6389_v17  ;;  %v3975_v51 = vmul.f32 %v6393_v1, %v6393_v1  ;;  %v3996_v7 = vadd.f32 %v3973_v30, %v3972_v53  ;;  %v5468_v53 = vld [vmem:[#allocation7 + $0x10] ss:$8 sps:$4 sm:$0xff]   ;;  %v5473_v30 = vld [vmem:[#allocation7 + $0x24] ss:$8 sps:$4 sm:$0xff]  }
 0x665   :  { %3930 = vadd.xlane.f32.xlu0 %v3929_v27  ;;  %v3932_v33 = vadd.f32 %v6404_v52, %v6401_v21  ;;  %v3999_v12 = vadd.f32 %v3975_v51, %v3974_v50  ;;  %v5467_v27 = vld [vmem:[#allocation7 + $0x4] ss:$8 sps:$4 sm:$0xff]   ;;  %v5476_v50 = vld [vmem:[#allocation7 + $0x34] ss:$8 sps:$4 sm:$0xff]   ;;  %v5474_v51 = vld [vmem:[#allocation7 + $0x30] ss:$8 sps:$4 sm:$0xff]  }
 0x666   :  { %4306 = vmatprep.subr.bf16.mxu0 %v5467_v27  ;;  %v5495_v27 = vld [vmem:[#allocation7 + $0xa0] ss:$8 sps:$4 sm:$0xff]  }
 0x667   :  { %3933 = vadd.xlane.f32.xlu1 %v3932_v33  ;;  %v5471_v33 = vld [vmem:[#allocation7 + $0x20] ss:$8 sps:$4 sm:$0xff]  }
 0x669   :  { %3997 = vadd.xlane.f32.xlu0 %v3996_v7  ;;  %v5479_v7 = vld [vmem:[#allocation7 + $0x44] ss:$8 sps:$4 sm:$0xff]  }
 0x66b   :  { %4000 = vadd.xlane.f32.xlu1 %v3999_v12 }
 0x679   :  { %v3907_v23 = vpop.xlane.xlu0 %3906 }
 0x67a   :  { %v3938_v14 = vmul.f32 0.00390625, %v3907_v23 }
 0x67b   :  { %v3910_v32 = vpop.xlane.xlu1 %3909 }
 0x67c   :  { %v6419_v35 = vsub.f32 %v6323_v9, %v3938_v14  ;;  %v6422_v38 = vsub.f32 %v6326_v28, %v3938_v14  ;;  %v3939_v29 = vmul.f32 0.00390625, %v3910_v32  ;;  %v5477_v14 = vld [vmem:[#allocation7 + $0x40] ss:$8 sps:$4 sm:$0xff]  }
 0x67e   :  { %v6425_v55 = vsub.f32 %v6329_v20, %v3939_v29  ;;  %v6428_v39 = vsub.f32 %v6332_v37, %v3939_v29  ;;  %v3976_v56 = vmul.f32 %v6419_v35, %v6419_v35  ;;  %v3977_v61 = vmul.f32 %v6422_v38, %v6422_v38  ;;  %v5482_v29 = vld [vmem:[#allocation7 + $0x54] ss:$8 sps:$4 sm:$0xff]  }
 0x680   :  { %v4002_v63 = vadd.f32 %v3977_v61, %v3976_v56  ;;  %v3978_v9 = vmul.f32 %v6425_v55, %v6425_v55  ;;  %v3979_v28 = vmul.f32 %v6428_v39, %v6428_v39 }
 0x681   :  { %v3913_v43 = vpop.xlane.xlu0 %3912 }
 0x682   :  { %v3940_v6 = vmul.f32 0.00390625, %v3913_v43  ;;  %4003 = vadd.xlane.f32.xlu0 %v4002_v63  ;;  %v4005_v20 = vadd.f32 %v3979_v28, %v3978_v9 }
 0x683   :  { %v3916_v44 = vpop.xlane.xlu1 %3915 }
 0x684   :  { %v6439_v37 = vsub.f32 %v6339_v46, %v3940_v6  ;;  %v6442_v45 = vsub.f32 %v6342_v40, %v3940_v6  ;;  %v3941_v48 = vmul.f32 0.00390625, %v3916_v44  ;;  %4006 = vadd.xlane.f32.xlu1 %v4005_v20  ;;  %v5480_v44 = vld [vmem:[#allocation7 + $0x50] ss:$8 sps:$4 sm:$0xff]  }
 0x686   :  { %v6445_v13 = vsub.f32 %v6345_v41, %v3941_v48  ;;  %v6448_v59 = vsub.f32 %v6348_v31, %v3941_v48  ;;  %v3980_v60 = vmul.f32 %v6439_v37, %v6439_v37  ;;  %v3981_v26 = vmul.f32 %v6442_v45, %v6442_v45 }
 0x688   :  { %v4008_v22 = vadd.f32 %v3981_v26, %v3980_v60  ;;  %v3982_v46 = vmul.f32 %v6445_v13, %v6445_v13  ;;  %v3983_v40 = vmul.f32 %v6448_v59, %v6448_v59 }
 0x68a   :  { %4009 = vadd.xlane.f32.xlu0 %v4008_v22  ;;  %v4011_v62 = vadd.f32 %v3983_v40, %v3982_v46 }
 0x68c   :  { %4012 = vadd.xlane.f32.xlu1 %v4011_v62 }
 0x6b8   :  { %v3919_v41 = vpop.xlane.xlu0 %3918 }
 0x6b9   :  { %v3942_v0 = vmul.f32 0.00390625, %v3919_v41 }
 0x6ba   :  { %v3922_v31 = vpop.xlane.xlu1 %3921 }
 0x6bb   :  { %v6459_v47 = vsub.f32 %v6355_v42, %v3942_v0  ;;  %v6462_v2 = vsub.f32 %v6358_v58, %v3942_v0  ;;  %v3943_v10 = vmul.f32 0.00390625, %v3922_v31  ;;  %v5488_v31 = vld [vmem:[#allocation7 + $0x74] ss:$8 sps:$4 sm:$0xff]  }
 0x6bd   :  { %v6465_v3 = vsub.f32 %v6361_v34, %v3943_v10  ;;  %v6468_v49 = vsub.f32 %v6364_v5, %v3943_v10  ;;  %v3984_v15 = vmul.f32 %v6459_v47, %v6459_v47  ;;  %v3985_v11 = vmul.f32 %v6462_v2, %v6462_v2  ;;  %v5465_v34 = vld [vmem:[#allocation7] ss:$8 sps:$4 sm:$0xff]   ;;  %v5470_v5 = vld [vmem:[#allocation7 + $0x14] ss:$8 sps:$4 sm:$0xff]  }
 0x6be   :  { %4307 = vmatpush1.bf16.msra.mxu0 %v5465_v34  ;;  %v5497_v34 = vld [vmem:[#allocation7 + $0xa4] ss:$8 sps:$4 sm:$0xff]  }
 0x6bf   :  { %v4014_v57 = vadd.f32 %v3985_v11, %v3984_v15  ;;  %v3986_v42 = vmul.f32 %v6465_v3, %v6465_v3  ;;  %v3987_v58 = vmul.f32 %v6468_v49, %v6468_v49  ;;  %4308 = vmatprep.subr.bf16.mxu0 %v5470_v5  ;;  %v5486_v11 = vld [vmem:[#allocation7 + $0x70] ss:$8 sps:$4 sm:$0xff]   ;;  %v5500_v5 = vld [vmem:[#allocation7 + $0xb4] ss:$8 sps:$4 sm:$0xff]  }
 0x6c1   :  { %4015 = vadd.xlane.f32.xlu0 %v4014_v57  ;;  %v4017_v18 = vadd.f32 %v3987_v58, %v3986_v42  ;;  %v5491_v57 = vld [vmem:[#allocation7 + $0x84] ss:$8 sps:$4 sm:$0xff]   ;;  %v5489_v42 = vld [vmem:[#allocation7 + $0x80] ss:$8 sps:$4 sm:$0xff]   ;;  %v5494_v58 = vld [vmem:[#allocation7 + $0x94] ss:$8 sps:$4 sm:$0xff]  }
 0x6c2   :  { %4309 = vmatpush1.bf16.msra.mxu0 %v5468_v53  ;;  %v5498_v53 = vld [vmem:[#allocation7 + $0xb0] ss:$8 sps:$4 sm:$0xff]  }
 0x6c3   :  { %4018 = vadd.xlane.f32.xlu1 %v4017_v18  ;;  %4310 = vmatprep.subr.bf16.mxu0 %v5473_v30  ;;  %v5492_v18 = vld [vmem:[#allocation7 + $0x90] ss:$8 sps:$4 sm:$0xff]   ;;  %v5503_v30 = vld [vmem:[#allocation7 + $0xc4] ss:$8 sps:$4 sm:$0xff]  }
 0x6c6   :  { %4311 = vmatpush1.bf16.msra.mxu0 %v5471_v33  ;;  %v5501_v33 = vld [vmem:[#allocation7 + $0xc0] ss:$8 sps:$4 sm:$0xff]  }
 0x6c7   :  { %4312 = vmatprep.subr.bf16.mxu0 %v5476_v50  ;;  %v5506_v50 = vld [vmem:[#allocation7 + $0xd4] ss:$8 sps:$4 sm:$0xff]  }
 0x6ca   :  { %4313 = vmatpush1.bf16.msra.mxu0 %v5474_v51  ;;  %v5504_v51 = vld [vmem:[#allocation7 + $0xd0] ss:$8 sps:$4 sm:$0xff]  }
 0x6cb   :  { %4314 = vmatprep.subr.bf16.mxu0 %v5479_v7  ;;  %v5507_v7 = vld [vmem:[#allocation7 + $0xe0] ss:$8 sps:$4 sm:$0xff]  }
 0x6ce   :  { %4315 = vmatpush1.bf16.msra.mxu0 %v5477_v14  ;;  %v5510_v14 = vld [vmem:[#allocation7 + $0xf0] ss:$8 sps:$4 sm:$0xff]  }
 0x6cf   :  { %4316 = vmatprep.subr.bf16.mxu0 %v5482_v29  ;;  %v5515_v29 = vld [vmem:[#allocation8 + $0x4] ss:$8 sps:$4 sm:$0xff]  }
 0x6d0   :  { %4547 = vmatprep.subr.bf16.mxu1 %v5515_v29 }
 0x6d2   :  { %4317 = vmatpush1.bf16.msra.mxu0 %v5480_v44  ;;  %v5524_v44 = vld [vmem:[#allocation8 + $0x34] ss:$8 sps:$4 sm:$0xff]  }
 0x6ee   :  { %v3925_v12 = vpop.xlane.xlu0 %3924 }
 0x6ef   :  { %v3944_v23 = vmul.f32 0.00390625, %v3925_v12  ;;  %v5509_v12 = vld [vmem:[#allocation7 + $0xe4] ss:$8 sps:$4 sm:$0xff]  }
 0x6f0   :  { %v3928_v32 = vpop.xlane.xlu1 %3927 }
 0x6f1   :  { %v6479_v56 = vsub.f32 %v6371_v8, %v3944_v23  ;;  %v6482_v61 = vsub.f32 %v6374_v19, %v3944_v23  ;;  %v3945_v63 = vmul.f32 0.00390625, %v3928_v32  ;;  %v5485_v19 = vld [vmem:[#allocation7 + $0x64] ss:$8 sps:$4 sm:$0xff]   ;;  %v5512_v23 = vld [vmem:[#allocation7 + $0xf4] ss:$8 sps:$4 sm:$0xff]  }
 0x6f2   :  { %v3931_v9 = vpop.xlane.xlu0 %3930  ;;  %4318 = vmatprep.subr.bf16.mxu0 %v5485_v19  ;;  %v5513_v32 = vld [vmem:[#allocation8] ss:$8 sps:$4 sm:$0xff]  }
 0x6f3   :  { %v6485_v28 = vsub.f32 %v6377_v25, %v3945_v63  ;;  %v6488_v43 = vsub.f32 %v6384_v54, %v3945_v63  ;;  %v3946_v6 = vmul.f32 0.00390625, %v3931_v9  ;;  %v3988_v20 = vmul.f32 %v6479_v56, %v6479_v56  ;;  %v5518_v63 = vld [vmem:[#allocation8 + $0x14] ss:$8 sps:$4 sm:$0xff]   ;;  %4548 = vmatpush1.bf16.msra.mxu1 %v5513_v32  ;;  %v5516_v9 = vld [vmem:[#allocation8 + $0x10] ss:$8 sps:$4 sm:$0xff]  }
 0x6f4   :  { %v3934_v48 = vpop.xlane.xlu1 %3933  ;;  %v3989_v8 = vmul.f32 %v6482_v61, %v6482_v61  ;;  %4549 = vmatprep.subr.bf16.mxu1 %v5518_v63  ;;  %v5525_v19 = vld [vmem:[#allocation8 + $0x40] ss:$8 sps:$4 sm:$0xff]  }
 0x6f5   :  { %v6495_v60 = vsub.f32 %v6389_v17, %v3946_v6  ;;  %v6498_v25 = vsub.f32 %v6396_v4, %v3946_v6  ;;  %v3947_v54 = vmul.f32 0.00390625, %v3934_v48  ;;  %v3990_v26 = vmul.f32 %v6485_v28, %v6485_v28  ;;  %v5483_v4 = vld [vmem:[#allocation7 + $0x60] ss:$8 sps:$4 sm:$0xff]   ;;  %v5521_v6 = vld [vmem:[#allocation8 + $0x24] ss:$8 sps:$4 sm:$0xff]  }
 0x6f6   :  { %v4020_v22 = vadd.f32 %v3989_v8, %v3988_v20  ;;  %v3991_v46 = vmul.f32 %v6488_v43, %v6488_v43  ;;  %4319 = vmatpush1.bf16.msra.mxu0 %v5483_v4  ;;  %v5519_v20 = vld [vmem:[#allocation8 + $0x20] ss:$8 sps:$4 sm:$0xff]   ;;  %v5522_v48 = vld [vmem:[#allocation8 + $0x30] ss:$8 sps:$4 sm:$0xff]   ;;  %v5527_v8 = vld [vmem:[#allocation8 + $0x44] ss:$8 sps:$4 sm:$0xff]  }
 0x6f7   :  { %v6505_v40 = vsub.f32 %v6401_v21, %v3947_v54  ;;  %v6508_v62 = vsub.f32 %v6404_v52, %v3947_v54  ;;  %v3992_v17 = vmul.f32 %v6495_v60, %v6495_v60  ;;  %v3993_v0 = vmul.f32 %v6498_v25, %v6498_v25  ;;  %4320 = vmatprep.subr.bf16.mxu0 %v5488_v31  ;;  %v5530_v54 = vld [vmem:[#allocation8 + $0x54] ss:$8 sps:$4 sm:$0xff]   ;;  %v5534_v4 = vld [vmem:[#allocation8 + $0x70] ss:$8 sps:$4 sm:$0xff]  }
 0x6f8   :  { %4021 = vadd.xlane.f32.xlu0 %v4020_v22  ;;  %v4023_v41 = vadd.f32 %v3991_v46, %v3990_v26  ;;  %4550 = vmatpush1.bf16.msra.mxu1 %v5516_v9  ;;  %v5528_v26 = vld [vmem:[#allocation8 + $0x50] ss:$8 sps:$4 sm:$0xff]   ;;  %v5533_v22 = vld [vmem:[#allocation8 + $0x64] ss:$8 sps:$4 sm:$0xff]   ;;  %v5531_v46 = vld [vmem:[#allocation8 + $0x60] ss:$8 sps:$4 sm:$0xff]  }
 0x6f9   :  { %v3994_v10 = vmul.f32 %v6505_v40, %v6505_v40  ;;  %v3995_v21 = vmul.f32 %v6508_v62, %v6508_v62  ;;  %v4026_v52 = vadd.f32 %v3993_v0, %v3992_v17  ;;  %4551 = vmatprep.subr.bf16.mxu1 %v5521_v6  ;;  %v5536_v17 = vld [vmem:[#allocation8 + $0x74] ss:$8 sps:$4 sm:$0xff]   ;;  %v5537_v0 = vld [vmem:[#allocation8 + $0x80] ss:$8 sps:$4 sm:$0xff]  }
 0x6fa   :  { %4024 = vadd.xlane.f32.xlu1 %v4023_v41  ;;  %4321 = vmatpush1.bf16.msra.mxu0 %v5486_v11  ;;  %v5539_v41 = vld [vmem:[#allocation8 + $0x84] ss:$8 sps:$4 sm:$0xff]   ;;  %v5542_v31 = vld [vmem:[#allocation8 + $0x94] ss:$8 sps:$4 sm:$0xff]   ;;  %v5546_v11 = vld [vmem:[#allocation8 + $0xb0] ss:$8 sps:$4 sm:$0xff]  }
 0x6fb   :  { %v4029_v15 = vadd.f32 %v3995_v21, %v3994_v10  ;;  %4322 = vmatprep.subr.bf16.mxu0 %v5491_v57  ;;  %v5540_v10 = vld [vmem:[#allocation8 + $0x90] ss:$8 sps:$4 sm:$0xff]   ;;  %v5545_v21 = vld [vmem:[#allocation8 + $0xa4] ss:$8 sps:$4 sm:$0xff]  }
 0x6fc   :  { %4027 = vadd.xlane.f32.xlu0 %v4026_v52  ;;  %4552 = vmatpush1.bf16.msra.mxu1 %v5519_v20  ;;  %v5543_v52 = vld [vmem:[#allocation8 + $0xa0] ss:$8 sps:$4 sm:$0xff]   ;;  %v5551_v57 = vld [vmem:[#allocation8 + $0xc4] ss:$8 sps:$4 sm:$0xff]  }
 0x6fd   :  { %4553 = vmatprep.subr.bf16.mxu1 %v5524_v44 }
 0x6fe   :  { %4030 = vadd.xlane.f32.xlu1 %v4029_v15  ;;  %4323 = vmatpush1.bf16.msra.mxu0 %v5489_v42  ;;  %v5548_v15 = vld [vmem:[#allocation8 + $0xb4] ss:$8 sps:$4 sm:$0xff]   ;;  %v5549_v42 = vld [vmem:[#allocation8 + $0xc0] ss:$8 sps:$4 sm:$0xff]  }
 0x6ff   :  { %4324 = vmatprep.subr.bf16.mxu0 %v5494_v58  ;;  %v5554_v58 = vld [vmem:[#allocation8 + $0xd4] ss:$8 sps:$4 sm:$0xff]  }
 0x700   :  { %4554 = vmatpush1.bf16.msra.mxu1 %v5522_v48 }
 0x701   :  { %4555 = vmatprep.subr.bf16.mxu1 %v5527_v8 }
 0x702   :  { %4325 = vmatpush1.bf16.msra.mxu0 %v5492_v18  ;;  %v5552_v18 = vld [vmem:[#allocation8 + $0xd0] ss:$8 sps:$4 sm:$0xff]  }
 0x703   :  { %4326 = vmatprep.subr.bf16.mxu0 %v5497_v34  ;;  %v3998_v34 = vpop.xlane.xlu0 %3997 }
 0x704   :  { %4556 = vmatpush1.bf16.msra.mxu1 %v5525_v19 }
 0x705   :  { %4557 = vmatprep.subr.bf16.mxu1 %v5530_v54 }
 0x706   :  { %4327 = vmatpush1.bf16.msra.mxu0 %v5495_v27  ;;  %v4001_v27 = vpop.xlane.xlu1 %4000 }
 0x707   :  { %4328 = vmatprep.subr.bf16.mxu0 %v5500_v5 }
 0x708   :  { %4558 = vmatpush1.bf16.msra.mxu1 %v5528_v26 }
 0x709   :  { %4559 = vmatprep.subr.bf16.mxu1 %v5533_v22 }
 0x70a   :  { %4329 = vmatpush1.bf16.msra.mxu0 %v5498_v53 }
 0x70b   :  { %4330 = vmatprep.subr.bf16.mxu0 %v5503_v30 }
 0x70c   :  { %4560 = vmatpush1.bf16.msra.mxu1 %v5531_v46 }
 0x70d   :  { %4561 = vmatprep.subr.bf16.mxu1 %v5536_v17 }
 0x70e   :  { %4331 = vmatpush1.bf16.msra.mxu0 %v5501_v33  ;;  %v4032_v33 = vmul.f32 0.00390625, %v3998_v34 }
 0x70f   :  { %4332 = vmatprep.subr.bf16.mxu0 %v5506_v50  ;;  %v4004_v5 = vpop.xlane.xlu0 %4003 }
 0x710   :  { %4562 = vmatpush1.bf16.msra.mxu1 %v5534_v4 }
 0x711   :  { %4563 = vmatprep.subr.bf16.mxu1 %v5539_v41  ;;  %v4007_v53 = vpop.xlane.xlu1 %4006 }
 0x712   :  { %4333 = vmatpush1.bf16.msra.mxu0 %v5504_v51  ;;  %v4033_v51 = vmul.f32 0.00390625, %v4001_v27 }
 0x713   :  { %4334 = vmatprep.subr.bf16.mxu0 %v5509_v12  ;;  %v4035_v12 = vmul.f32 0.00390625, %v4007_v53 }
 0x714   :  { %4564 = vmatpush1.bf16.msra.mxu1 %v5537_v0  ;;  %v4045_v63 = vadd.f32 1e-05, %v4033_v51 }
 0x715   :  { %4565 = vmatprep.subr.bf16.mxu1 %v5542_v31  ;;  %v4047_v44 = vadd.f32 1e-05, %v4035_v12 }
 0x716   :  { %4335 = vmatpush1.bf16.msra.mxu0 %v5507_v7  ;;  %v4034_v7 = vmul.f32 0.00390625, %v4004_v5 }
 0x717   :  { %4336 = vmatprep.subr.bf16.mxu0 %v5512_v23  ;;  %v4010_v30 = vpop.xlane.xlu0 %4009 }
 0x718   :  { %4566 = vmatpush1.bf16.msra.mxu1 %v5540_v10  ;;  %v4036_v32 = vmul.f32 0.00390625, %v4010_v30  ;;  %v4046_v6 = vadd.f32 1e-05, %v4034_v7 }
 0x719   :  { %4567 = vmatprep.subr.bf16.mxu1 %v5545_v21  ;;  %v4013_v50 = vpop.xlane.xlu1 %4012 }
 0x71a   :  { %4337 = vmatpush1.bf16.msra.mxu0 %v5510_v14  ;;  %v4044_v14 = vadd.f32 1e-05, %v4032_v33  ;;  %v4037_v9 = vmul.f32 0.00390625, %v4013_v50  ;;  %v4048_v8 = vadd.f32 1e-05, %v4036_v32 }
 0x71c   :  { %4568 = vmatpush1.bf16.msra.mxu1 %v5543_v52  ;;  %5609 = vrsqrt.f32 %v4044_v14  ;;  %v4049_v19 = vadd.f32 1e-05, %v4037_v9 }
 0x71d   :  { %4569 = vmatprep.subr.bf16.mxu1 %v5548_v15  ;;  %5611 = vrsqrt.f32 %v4045_v63 }
 0x71e   :  { %5613 = vrsqrt.f32 %v4046_v6 }
 0x71f   :  { %5615 = vrsqrt.f32 %v4047_v44 }
 0x720   :  { %4570 = vmatpush1.bf16.msra.mxu1 %v5546_v11  ;;  %5617 = vrsqrt.f32 %v4048_v8 }
 0x721   :  { %4571 = vmatprep.subr.bf16.mxu1 %v5551_v57  ;;  %5619 = vrsqrt.f32 %v4049_v19 }
 0x724   :  { %4572 = vmatpush1.bf16.msra.mxu1 %v5549_v42 }
 0x725   :  { %4573 = vmatprep.subr.bf16.mxu1 %v5554_v58 }
 0x726   :  { %v5610_v21 = vpop.eup %5609 }
 0x727   :  { %v5612_v15 = vpop.eup %5611  ;;  %v4068_v7 = vmul.f32 %v5610_v21, %v6379_v36  ;;  %v4069_v12 = vmul.f32 %v5610_v21, %v6381_v24 }
 0x728   :  { %4574 = vmatpush1.bf16.msra.mxu1 %v5552_v18  ;;  %v5614_v42 = vpop.eup %5613  ;;  %v4070_v32 = vmul.f32 %v5612_v15, %v6391_v16 }
 0x729   :  { %v5616_v58 = vpop.eup %5615  ;;  %v4072_v5 = vmul.f32 %v5614_v42, %v6419_v35  ;;  %v4073_v53 = vmul.f32 %v5614_v42, %v6422_v38  ;;  %v4071_v35 = vmul.f32 %v5612_v15, %v6393_v1  ;;  %v5560_v15 = vld [vmem:[#allocation8 + $0xf4] ss:$8 sps:$4 sm:$0xff]  }
 0x72a   :  { %v5618_v34 = vpop.eup %5617  ;;  %v4074_v33 = vmul.f32 %v5616_v58, %v6425_v55  ;;  %v4075_v50 = vmul.f32 %v5616_v58, %v6428_v39 }
 0x72b   :  { %v5620_v27 = vpop.eup %5619  ;;  %v4077_v14 = vmul.f32 %v5618_v34, %v6442_v45  ;;  %v4092_v63 = vadd.f32 %v4072_v5, %v4068_v7  ;;  %v4097_v9 = vadd.f32 %v4073_v53, %v4069_v12 }
 0x72c   :  { %v4078_v38 = vmul.f32 %v5620_v27, %v6445_v13  ;;  %v4102_v24 = vadd.f32 %v4074_v33, %v4070_v32  ;;  %v4107_v6 = vadd.f32 %v4075_v50, %v4071_v35 }
 0x72e   :  { %v4103_v44 = vadd.f32 %v4102_v24, %v4078_v38 }
 0x74e   :  { %v4016_v23 = vpop.xlane.xlu0 %4015 }
 0x74f   :  { %v4038_v20 = vmul.f32 0.00390625, %v4016_v23  ;;  %v4076_v23 = vmul.f32 %v5618_v34, %v6439_v37 }
 0x750   :  { %v4019_v29 = vpop.xlane.xlu1 %4018 }
 0x751   :  { %v4039_v48 = vmul.f32 0.00390625, %v4019_v29  ;;  %v4050_v54 = vadd.f32 1e-05, %v4038_v20  ;;  %v4079_v29 = vmul.f32 %v5620_v27, %v6448_v59  ;;  %v4093_v20 = vadd.f32 %v4092_v63, %v4076_v23 }
 0x752   :  { %v4098_v59 = vadd.f32 %v4097_v9, %v4077_v14 }
 0x753   :  { %v4051_v26 = vadd.f32 1e-05, %v4039_v48  ;;  %5621 = vrsqrt.f32 %v4050_v54 }
 0x755   :  { %5623 = vrsqrt.f32 %v4051_v26 }
 0x75d   :  { %v5622_v30 = vpop.eup %5621 }
 0x75e   :  { %v4080_v39 = vmul.f32 %v5622_v30, %v6459_v47  ;;  %v4081_v36 = vmul.f32 %v5622_v30, %v6462_v2  ;;  %v4108_v2 = vadd.f32 %v4107_v6, %v4079_v29 }
 0x75f   :  { %v5624_v51 = vpop.eup %5623 }
 0x760   :  { %v4082_v37 = vmul.f32 %v5624_v51, %v6465_v3  ;;  %v4083_v45 = vmul.f32 %v5624_v51, %v6468_v49  ;;  %v4099_v19 = vadd.f32 %v4098_v59, %v4081_v36  ;;  %v4094_v54 = vadd.f32 %v4093_v20, %v4080_v39 }
 0x762   :  { %v4109_v49 = vadd.f32 %v4108_v2, %v4083_v45 }
 0x785   :  { %v4022_v22 = vpop.xlane.xlu0 %4021 }
 0x786   :  { %v4040_v46 = vmul.f32 0.00390625, %v4022_v22  ;;  %v4104_v22 = vadd.f32 %v4103_v44, %v4082_v37 }
 0x787   :  { %v4025_v17 = vpop.xlane.xlu1 %4024 }
 0x788   :  { %v4052_v4 = vadd.f32 1e-05, %v4040_v46  ;;  %v4041_v41 = vmul.f32 0.00390625, %v4025_v17 }
 0x789   :  { %v4028_v0 = vpop.xlane.xlu0 %4027 }
 0x78a   :  { %5625 = vrsqrt.f32 %v4052_v4  ;;  %v4053_v31 = vadd.f32 1e-05, %v4041_v41  ;;  %v4042_v10 = vmul.f32 0.00390625, %v4028_v0 }
 0x78b   :  { %v4031_v52 = vpop.xlane.xlu1 %4030 }
 0x78c   :  { %5627 = vrsqrt.f32 %v4053_v31  ;;  %v4054_v11 = vadd.f32 1e-05, %v4042_v10  ;;  %v4043_v57 = vmul.f32 0.00390625, %v4031_v52 }
 0x78e   :  { %5629 = vrsqrt.f32 %v4054_v11  ;;  %v4055_v18 = vadd.f32 1e-05, %v4043_v57  ;;  %v5558_v11 = vld [vmem:[#allocation8 + $0xf0] ss:$8 sps:$4 sm:$0xff]  }
 0x790   :  { %5631 = vrsqrt.f32 %v4055_v18 }
 0x794   :  { %v5626_v55 = vpop.eup %5625 }
 0x795   :  { %v4084_v1 = vmul.f32 %v5626_v55, %v6479_v56  ;;  %v4085_v13 = vmul.f32 %v5626_v55, %v6482_v61 }
 0x796   :  { %v5628_v16 = vpop.eup %5627 }
 0x797   :  { %v4086_v48 = vmul.f32 %v5628_v16, %v6485_v28  ;;  %v4087_v47 = vmul.f32 %v5628_v16, %v6488_v43  ;;  %v4100_v56 = vadd.f32 %v4099_v19, %v4085_v13  ;;  %v4095_v17 = vadd.f32 %v4094_v54, %v4084_v1 }
 0x798   :  { %v5630_v8 = vpop.eup %5629 }
 0x799   :  { %v4089_v3 = vmul.f32 %v5630_v8, %v6498_v25  ;;  %v4088_v26 = vmul.f32 %v5630_v8, %v6495_v60  ;;  %v4110_v4 = vadd.f32 %v4109_v49, %v4087_v47  ;;  %v4105_v41 = vadd.f32 %v4104_v22, %v4086_v48  ;;  %v5557_v25 = vld [vmem:[#allocation8 + $0xe4] ss:$8 sps:$4 sm:$0xff]   ;;  %v5555_v60 = vld [vmem:[#allocation8 + $0xe0] ss:$8 sps:$4 sm:$0xff]  }
 0x79a   :  { %v5632_v46 = vpop.eup %5631  ;;  %4575 = vmatprep.subr.bf16.mxu1 %v5557_v25 }
 0x79b   :  { %v4091_v61 = vmul.f32 %v5632_v46, %v6508_v62  ;;  %v4090_v28 = vmul.f32 %v5632_v46, %v6505_v40  ;;  %v4101_v43 = vadd.f32 %v4100_v56, %v4089_v3  ;;  %v4096_v31 = vadd.f32 %v4095_v17, %v4088_v26  ;;  %4576 = vmatpush1.bf16.msra.mxu1 %v5555_v60 }
 0x79c   :  { %4577 = vmatprep.subr.bf16.mxu1 %v5560_v15 }
 0x79d   :  { %v4111_v0 = vadd.f32 %v4110_v4, %v4091_v61  ;;  %v4106_v10 = vadd.f32 %v4105_v41, %v4090_v28 }
 0x79f   :  { %v4113_v21 = vpack.c.bf16 %v4111_v0, %v4101_v43  ;;  %v4112_v52 = vpack.c.bf16 %v4106_v10, %v4096_v31  ;;  %4578 = vmatpush1.bf16.msra.mxu1 %v5558_v11 }
 0x7a1   :  { %4338 = vmatprep.mubr.bf16.mxu0 %v4113_v21 }
 0x7a2   :  { %4339 = vmatmul.mubr.bf16.vlgmr.msra.gmra.mrb[40].mxu0 %v4112_v52 }
 0x875   :  { %v4340_v62 = vpop.f32.mrb[40].mxu0 }
 0x876   :  { %v4342_v57 = vpop.f32.mrb[41].mxu0  ;;  %v4349_v42 = vmax.f32 %v4340_v62, 0.0 }
 0x877   :  { %v4344_v40 = vpop.f32.mrb[42].mxu0  ;;  %v4350_v34 = vmax.f32 %v4342_v57, 0.0 }
 0x878   :  { %v4351_v58 = vmax.f32 %v4344_v40, 0.0  ;;  %v4346_v18 = vpop.f32.mrb[43].mxu0 }
 0x879   :  { %v4352_v27 = vmax.f32 %v4346_v18, 0.0 }
 0x87a   :  { %v4353_v5 = vpack.c.bf16 %v4351_v58, %v4349_v42 }
 0x87b   :  { %v4354_v53 = vpack.c.bf16 %v4352_v27, %v4350_v34 }
 0x87d   :  { %4579 = vmatprep.mubr.bf16.mxu1 %v4354_v53 }
 0x87e   :  { %4580 = vmatmul.mubr.bf16.vlgmr.msra.gmra.mrb[52].mxu1 %v4353_v5 }
 0x951   :  { %v4581_v30 = vpop.f32.mrb[52].mxu1 }
 0x952   :  { %v4582_v33 = vadd.f32 %v4581_v30, %v4096_v31  ;;  %v4583_v50 = vpop.f32.mrb[53].mxu1 }
 0x953   :  { %v4584_v51 = vadd.f32 %v4583_v50, %v4101_v43  ;;  %v4585_v7 = vpop.f32.mrb[54].mxu1 }
 0x954   :  { %v4586_v12 = vadd.f32 %v4585_v7, %v4106_v10  ;;  %v4587_v23 = vpop.f32.mrb[55].mxu1 }
 0x955   :  { %v4588_v14 = vadd.f32 %v4587_v23, %v4111_v0  ;;  %v4590_v32 = vadd.f32 %v4584_v51, %v4582_v33 }
 0x957   :  { %4591 = vadd.xlane.f32.xlu0 %v4590_v32  ;;  %v4593_v35 = vadd.f32 %v4588_v14, %v4586_v12 }
 0x959   :  { %4594 = vadd.xlane.f32.xlu1 %v4593_v35 }
 0x9e4   :  { %v4592_v38 = vpop.xlane.xlu0 %4591 }
 0x9e5   :  { %v4596_v29 = vmul.f32 0.00390625, %v4592_v38 }
 0x9e6   :  { %v4595_v55 = vpop.xlane.xlu1 %4594 }
 0x9e7   :  { %v4598_v63 = vsub.f32 %v4582_v33, %v4596_v29  ;;  %v4599_v39 = vsub.f32 %v4584_v51, %v4596_v29  ;;  %v4597_v36 = vmul.f32 0.00390625, %v4595_v55 }
 0x9e9   :  { %v4600_v9 = vsub.f32 %v4586_v12, %v4597_v36  ;;  %v4601_v24 = vsub.f32 %v4588_v14, %v4597_v36  ;;  %v4602_v37 = vmul.f32 %v4598_v63, %v4598_v63  ;;  %v4603_v45 = vmul.f32 %v4599_v39, %v4599_v39 }
 0x9eb   :  { %v4606_v6 = vadd.f32 %v4603_v45, %v4602_v37  ;;  %v4604_v16 = vmul.f32 %v4600_v9, %v4600_v9  ;;  %v4605_v20 = vmul.f32 %v4601_v24, %v4601_v24 }
 0x9ed   :  { %4607 = vadd.xlane.f32.xlu0 %v4606_v6  ;;  %v4609_v1 = vadd.f32 %v4605_v20, %v4604_v16 }
 0x9ef   :  { %4610 = vadd.xlane.f32.xlu1 %v4609_v1 }
 0xa7a   :  { %v4608_v13 = vpop.xlane.xlu0 %4607 }
 0xa7b   :  { %v4612_v59 = vmul.f32 0.00390625, %v4608_v13 }
 0xa7c   :  { %v4611_v44 = vpop.xlane.xlu1 %4610 }
 0xa7d   :  { %v4614_v48 = vadd.f32 1e-05, %v4612_v59  ;;  %v4613_v47 = vmul.f32 0.00390625, %v4611_v44 }
 0xa7f   :  { %5633 = vrsqrt.f32 %v4614_v48  ;;  %v4615_v2 = vadd.f32 1e-05, %v4613_v47 }
 0xa81   :  { %5635 = vrsqrt.f32 %v4615_v2 }
 0xa89   :  { %v5634_v8 = vpop.eup %5633 }
 0xa8a   :  { %v4618_v19 = vmul.f32 %v5634_v8, %v4598_v63  ;;  %v4619_v54 = vmul.f32 %v5634_v8, %v4599_v39 }
 0xa8b   :  { %v5636_v3 = vpop.eup %5635 }
 0xa8c   :  { %4622 = vst [vmem:[#allocation10] sm:$0xff] %v4618_v19  ;;  %4623 = vst [vmem:[#allocation10 + $0x8] sm:$0xff] %v4619_v54  ;;  %v4620_v49 = vmul.f32 %v5636_v3, %v4600_v9  ;;  %v4621_v26 = vmul.f32 %v5636_v3, %v4601_v24 }
 0xa8e   :  { %4624 = vst [vmem:[#allocation10 + $0x10] sm:$0xff] %v4620_v49  ;;  %4625 = vst [vmem:[#allocation10 + $0x18] sm:$0xff] %v4621_v26 }
 0xa8f   :  { %5736 = shalt.err (!%p5733_p8)
}
 0xa90   :  { %s5737_s5 = scalar_lea.hbm %s6562_s8, 512 }
 0xa91   :  { %p5738_p9 = scmp.ne.s32.totalorder %s6562_s8, %s5737_s5  ;;  %p5741_p10 = scmp.lt.u32.totalorder %s5737_s5, %s6562_s8 }
 0xa93   :  { %p5743_p11 = pnand %p5741_p10, %p5738_p9 }
 0xa95   :  { %5746 = shalt.err (!%p5743_p11)
}
 0xa96   :  { %s5770_s10 = smov 256   ;;  %s5771_s11 = smov 16  }
 0xa97   :  { %4637 = dma.vmem_to_hbm [thread:$0]  %s4632_s25, 512, %s6562_s8, [#allocation4], %s5770_s10, %s5770_s10, %s5771_s11  }
 0xa98   :  { %5753 = dma.done.wait [#allocation4], 512  }
 0xa99   :  { %5754 = vsyncadd [#allocation4], 4294966784 }
 0xa9a   :  { %4641 = vsyncpa [#allocation3], 1 }
 0xa9b   :  { %4642 = vsyncpa [#allocation6], 1 }
 0xa9c   :  { %4643 = vsyncpa [#allocation9], 1 }
 0xa9d   :  { %4644 = vsyncpa [#allocation4], 1 }

</bundles_post_ra>
